<compile_context>
chip_gen: v7x
topology: tpu7x:2x2x1
jax: 0.10.0
libtpu: 0.0.40
codegen_flags: <defaults>
</compile_context>

<pallas_src>
import functools
import math

import jax
import jax.numpy as jnp
from jax.experimental import pallas as pl
from jax.experimental.pallas import tpu as pltpu


def _eff_attn_kernel(
    x_l_ref, x_g_ref,
    w_l_ref, b_l_ref,          # stacked [k1;q1;v1] weights / biases
    w_g_ref, b_g_ref,          # stacked [k2;q2;v2] weights / biases
    rw_ref,
    out_l_ref, out_g_ref,
    *, head_count, s_valid,
):
    x_l = x_l_ref[...].astype(jnp.float32)       # (c1, s_pad)
    x_g = x_g_ref[...].astype(jnp.float32)       # (c2, s_pad)
    c1 = x_l.shape[0]
    c2 = x_g.shape[0]
    s_pad = x_l.shape[1]
    hc1 = c1 // head_count
    hc2 = c2 // head_count
    rw = rw_ref[0]                               # scalar resweight from SMEM

    def fused_proj(w_ref, b_ref, x):
        # Stacked 1x1 conv: (3C, C) @ (C, S) on the MXU, bf16 in / f32 acc.
        w = w_ref[...]                           # bf16, host-packed
        acc = jnp.dot(w, x.astype(jnp.bfloat16),
                      preferred_element_type=jnp.float32)
        return acc + b_ref[...]                  # (3C, 1) f32 bias broadcast

    proj_l = fused_proj(w_l_ref, b_l_ref, x_l)   # rows: [k1; q1; v1]
    proj_g = fused_proj(w_g_ref, b_g_ref, x_g)   # rows: [k2; q2; v2]

    def spatial_softmax(z):
        # softmax over the spatial (lane) axis; padded lanes get 0 probability.
        m = jnp.max(z, axis=-1, keepdims=True)
        e = jnp.exp(z - m)
        if z.shape[-1] != s_valid:
            lane = jax.lax.broadcasted_iota(jnp.int32, z.shape, 1)
            e = jnp.where(lane < s_valid, e, 0.0)
        denom = jnp.sum(e, axis=-1, keepdims=True)
        return e * pl.reciprocal(denom, approx=False)

    def channel_softmax(z):
        # softmax over the head-channel (sublane) axis, per spatial column.
        m = jnp.max(z, axis=0, keepdims=True)
        e = jnp.exp(z - m)
        denom = jnp.sum(e, axis=0, keepdims=True)
        return e * pl.reciprocal(denom, approx=False)

    def branch(k, q, v, x_res, hc_kq, hc_v, out_ref):
        # per head: ctx = softmax_s(k_h) @ v_h^T ; att = ctx^T @ softmax_c(q_h)
        ks = spatial_softmax(k)
        for i in range(head_count):
            key = ks[i * hc_kq:(i + 1) * hc_kq, :]                     # (hc_kq, s)
            query = channel_softmax(q[i * hc_kq:(i + 1) * hc_kq, :])   # (hc_kq, s)
            value = v[i * hc_v:(i + 1) * hc_v, :]                      # (hc_v, s)
            ctx = jax.lax.dot_general(
                key, value, (((1,), (1,)), ((), ())),
                preferred_element_type=jnp.float32)                    # (hc_kq, hc_v)
            att = jax.lax.dot_general(
                ctx, query, (((0,), (0,)), ((), ())),
                preferred_element_type=jnp.float32)                    # (hc_v, s)
            out_ref[i * hc_v:(i + 1) * hc_v, :] = (
                x_res[i * hc_v:(i + 1) * hc_v, :] + att * rw
            ).astype(out_ref.dtype)

    # Branch A: (k1, q1, v2) -> att2 -> out_g   (store before starting branch B
    # so only one branch's temporaries are live at a time).
    branch(proj_l[0:c1, :], proj_l[c1:2 * c1, :], proj_g[2 * c2:3 * c2, :],
           x_g, hc1, hc2, out_g_ref)
    # Branch B: (k2, q2, v1) -> att1 -> out_l
    branch(proj_g[0:c2, :], proj_g[c2:2 * c2, :], proj_l[2 * c1:3 * c1, :],
           x_l, hc2, hc1, out_l_ref)


def _vmem_capacity_bytes():
    try:
        info = pltpu.get_tpu_info()
        cap = getattr(info, "vmem_capacity_bytes", None)
        if cap:
            return int(cap)
    except Exception:
        pass
    return 64 << 20  # conservative: v7x per-TensorCore VMEM


def efficient_attention(x_l, x_g, params, head_count):
    """Pallas TPU implementation of EfficientAttention.forward."""
    n, c1, h, w = x_l.shape
    n2, c2, h2, w2 = x_g.shape
    assert n == n2 and h == h2 and w == w2
    assert c1 % head_count == 0 and c2 % head_count == 0
    s = h * w
    s_pad = ((s + 127) // 128) * 128             # lane-dense spatial axis

    x_l_f = x_l.reshape(n, c1, s)
    x_g_f = x_g.reshape(n, c2, s)
    if s_pad != s:
        pad = ((0, 0), (0, 0), (0, s_pad - s))
        x_l_f = jnp.pad(x_l_f, pad)
        x_g_f = jnp.pad(x_g_f, pad)

    # Host-side packing: stacked [k;q;v] weights (bf16 for the MXU) + biases.
    w_l = jnp.concatenate(
        [params["wk1"], params["wq1"], params["wv1"]], axis=0).astype(jnp.bfloat16)
    b_l = jnp.concatenate(
        [params["bk1"], params["bq1"], params["bv1"]], axis=0
    ).reshape(-1, 1).astype(jnp.float32)
    w_g = jnp.concatenate(
        [params["wk2"], params["wq2"], params["wv2"]], axis=0).astype(jnp.bfloat16)
    b_g = jnp.concatenate(
        [params["bk2"], params["bq2"], params["bv2"]], axis=0
    ).reshape(-1, 1).astype(jnp.float32)
    rw = params["resweight"].reshape(1).astype(jnp.float32)

    args = (x_l_f, x_g_f, w_l, b_l, w_g, b_g, rw)

    def slab_spec(c):
        # One full (C, S_pad) slab per batch element; batch dim squeezed away.
        return pl.BlockSpec((None, c, s_pad), lambda b: (b, 0, 0))

    def full_spec(shape):
        nd = len(shape)
        return pl.BlockSpec(shape, lambda b: (0,) * nd)   # resident across grid

    in_specs = [
        slab_spec(c1),
        slab_spec(c2),
        full_spec((3 * c1, c1)), full_spec((3 * c1, 1)),
        full_spec((3 * c2, c2)), full_spec((3 * c2, 1)),
        pl.BlockSpec(memory_space=pltpu.MemorySpace.SMEM),   # resweight scalar
    ]
    out_specs = (slab_spec(c1), slab_spec(c2))
    out_shape = (
        jax.ShapeDtypeStruct((n, c1, s_pad), x_l.dtype),
        jax.ShapeDtypeStruct((n, c2, s_pad), x_g.dtype),
    )

    # VMEM budget: double-buffered in/out slabs + resident packed weights +
    # in-kernel working set, capped at 75% of the device's physical VMEM.
    slab = (c1 + c2) * s_pad * 4
    w_bytes = 3 * (c1 * c1 + c2 * c2) * 2 + 3 * (c1 + c2) * 4
    est = 4 * slab + 2 * w_bytes + 10 * slab
    cap = _vmem_capacity_bytes()
    vmem_limit = int(min(max(2 * est, 8 << 20), (cap * 3) // 4))

    proj_flops = 2 * 3 * (c1 * c1 + c2 * c2) * s_pad
    attn_flops = 8 * (c1 * c2 // head_count) * s_pad
    cost = pl.CostEstimate(
        flops=int(n * (proj_flops + attn_flops)),
        transcendentals=int(n * 2 * (c1 + c2) * s_pad),
        bytes_accessed=int(2 * n * slab + w_bytes),
    )

    kernel = functools.partial(_eff_attn_kernel,
                               head_count=head_count, s_valid=s)

    out_l_f, out_g_f = pl.pallas_call(
        kernel,
        out_shape=out_shape,
        grid_spec=pltpu.PrefetchScalarGridSpec(
            num_scalar_prefetch=0,
            grid=(n,),
            in_specs=in_specs,
            out_specs=out_specs,
        ),
        compiler_params=pltpu.CompilerParams(
            dimension_semantics=("parallel",),   # batch rows independent
            vmem_limit_bytes=vmem_limit,
        ),
        cost_estimate=cost,
    )(*args)

    out_l_f = out_l_f[:, :, :s].reshape(n, c1, h, w)
    out_g_f = out_g_f[:, :, :s].reshape(n, c2, h, w)
    return out_l_f, out_g_f


def efficient_attention_ref(x_l, x_g, params, head_count,
                            proj_dtype=jnp.float32):
    """Plain-JAX reference mirroring the PyTorch forward.

    proj_dtype=jnp.bfloat16 mirrors the kernel's bf16 MXU projection inputs
    (with f32 accumulation) for a tight numerical check.
    """
    n, c1, h, w = x_l.shape
    _, c2, _, _ = x_g.shape
    s = h * w

    def conv1x1(x, wname, bname):
        xf = x.reshape(n, -1, s)
        wm = params[wname].astype(proj_dtype).astype(jnp.float32)
        xm = xf.astype(proj_dtype).astype(jnp.float32)
        return (jnp.einsum("oc,ncs->nos", wm, xm)
                + params[bname].astype(jnp.float32)[None, :, None])

    k1 = conv1x1(x_l, "wk1", "bk1")
    q1 = conv1x1(x_l, "wq1", "bq1")
    v1 = conv1x1(x_l, "wv1", "bv1")
    k2 = conv1x1(x_g, "wk2", "bk2")
    q2 = conv1x1(x_g, "wq2", "bq2")
    v2 = conv1x1(x_g, "wv2", "bv2")

    hc1 = c1 // head_count
    hc2 = c2 // head_count
    att1, att2 = [], []
    for i in range(head_count):
        key = jax.nn.softmax(k1[:, i * hc1:(i + 1) * hc1, :], axis=2)
        query = jax.nn.softmax(q1[:, i * hc1:(i + 1) * hc1, :], axis=1)
        value = v2[:, i * hc2:(i + 1) * hc2, :]
        ctx = jnp.einsum("nks,nvs->nkv", key, value)
        att2.append(jnp.einsum("nkv,nks->nvs", ctx, query))

        key = jax.nn.softmax(k2[:, i * hc2:(i + 1) * hc2, :], axis=2)
        query = jax.nn.softmax(q2[:, i * hc2:(i + 1) * hc2, :], axis=1)
        value = v1[:, i * hc1:(i + 1) * hc1, :]
        ctx = jnp.einsum("nks,nvs->nkv", key, value)
        att1.append(jnp.einsum("nkv,nks->nvs", ctx, query))

    agg1 = jnp.concatenate(att1, axis=1).reshape(n, c1, h, w)
    agg2 = jnp.concatenate(att2, axis=1).reshape(n, c2, h, w)
    rw = params["resweight"][0]
    return x_l + agg1 * rw, x_g + agg2 * rw


if __name__ == "__main__":
    batch, c1, c2, h, w, head_count = 2, 16, 32, 8, 8, 4

    key = jax.random.PRNGKey(0)
    ks = jax.random.split(key, 16)

    def conv_init(kw, kb, c):
        scale = 1.0 / math.sqrt(c)
        wgt = jax.random.uniform(kw, (c, c), jnp.float32, -scale, scale)
        bia = jax.random.uniform(kb, (c,), jnp.float32, -scale, scale)
        return wgt, bia

    params = {}
    params["wk1"], params["bk1"] = conv_init(ks[0], ks[1], c1)
    params["wq1"], params["bq1"] = conv_init(ks[2], ks[3], c1)
    params["wv1"], params["bv1"] = conv_init(ks[4], ks[5], c1)
    params["wk2"], params["bk2"] = conv_init(ks[6], ks[7], c2)
    params["wq2"], params["bq2"] = conv_init(ks[8], ks[9], c2)
    params["wv2"], params["bv2"] = conv_init(ks[10], ks[11], c2)
    # nn.Parameter(torch.Tensor([0])) would make the output identical to the
    # input; use a nonzero value here so the attention path is exercised.
    params["resweight"] = jnp.array([0.5], dtype=jnp.float32)

    x_l = jax.random.normal(ks[12], (batch, c1, h, w), dtype=jnp.float32)
    x_g = jax.random.normal(ks[13], (batch, c2, h, w), dtype=jnp.float32)

    out_l, out_g = efficient_attention(x_l, x_g, params, head_count)
    out_l, out_g = jax.block_until_ready((out_l, out_g))
    assert out_l.shape == x_l.shape and out_g.shape == x_g.shape

    # Tight check against a reference that mirrors the kernel's bf16 MXU
    # projection inputs (f32 accumulation, f32 everything else).
    ref_l, ref_g = efficient_attention_ref(
        x_l, x_g, params, head_count, proj_dtype=jnp.bfloat16)
    assert jnp.allclose(out_l, ref_l, atol=2e-3, rtol=2e-3), \
        float(jnp.max(jnp.abs(out_l - ref_l)))
    assert jnp.allclose(out_g, ref_g, atol=2e-3, rtol=2e-3), \
        float(jnp.max(jnp.abs(out_g - ref_g)))

    # Loose sanity check against the pure-f32 reference (the only deliberate
    # deviation is bf16 MXU inputs on the projection matmuls).
    ref32_l, ref32_g = efficient_attention_ref(x_l, x_g, params, head_count)
    assert jnp.allclose(out_l, ref32_l, atol=5e-2, rtol=5e-2), \
        float(jnp.max(jnp.abs(out_l - ref32_l)))
    assert jnp.allclose(out_g, ref32_g, atol=5e-2, rtol=5e-2), \
        float(jnp.max(jnp.abs(out_g - ref32_g)))

    print("KERNEL_OK")
</pallas_src>

<mosaic_0001>
module attributes {stable_mosaic.version = 11 : i64} {
  func.func @_eff_attn_kernel(%arg0: i32, %arg1: memref<1x16x128xf32, #tpu.memory_space<vmem>>, %arg2: memref<1x32x128xf32, #tpu.memory_space<vmem>>, %arg3: memref<48x16xbf16, #tpu.memory_space<vmem>>, %arg4: memref<48x1xf32, #tpu.memory_space<vmem>>, %arg5: memref<96x32xbf16, #tpu.memory_space<vmem>>, %arg6: memref<96x1xf32, #tpu.memory_space<vmem>>, %arg7: memref<1xf32, #tpu.memory_space<smem>>, %arg8: memref<1x16x128xf32, #tpu.memory_space<vmem>>, %arg9: memref<1x32x128xf32, #tpu.memory_space<vmem>>) attributes {dimension_semantics = [#tpu.dimension_semantics<parallel>], iteration_bounds = array<i64: 2>, scalar_prefetch = 0 : i64, scratch_operands = 0 : i64, tpu.core_type = #tpu.core_type<tc>, window_params = [{transform_indices = @transform_0, window_bounds = array<i64: 1, 16, 128>}, {transform_indices = @transform_1, window_bounds = array<i64: 1, 32, 128>}, {pipeline_mode = #tpu.pipeline_mode<synchronous>, transform_indices = @transform_2, window_bounds = array<i64: 48, 16>}, {pipeline_mode = #tpu.pipeline_mode<synchronous>, transform_indices = @transform_3, window_bounds = array<i64: 48, 1>}, {pipeline_mode = #tpu.pipeline_mode<synchronous>, transform_indices = @transform_4, window_bounds = array<i64: 96, 32>}, {pipeline_mode = #tpu.pipeline_mode<synchronous>, transform_indices = @transform_5, window_bounds = array<i64: 96, 1>}, {transform_indices = @transform_6, window_bounds = array<i64: 1>}, {transform_indices = @transform_7, window_bounds = array<i64: 1, 16, 128>}, {transform_indices = @transform_8, window_bounds = array<i64: 1, 32, 128>}]} {
    %c0 = arith.constant 0 : index
    %c0_0 = arith.constant 0 : index
    %c0_1 = arith.constant 0 : index
    %0 = vector.load %arg1[%c0, %c0_0, %c0_1] : memref<1x16x128xf32, #tpu.memory_space<vmem>>, vector<1x16x128xf32>
    %1 = vector.shape_cast %0 : vector<1x16x128xf32> to vector<16x128xf32>
    %c0_2 = arith.constant 0 : index
    %c0_3 = arith.constant 0 : index
    %c0_4 = arith.constant 0 : index
    %2 = vector.load %arg2[%c0_2, %c0_3, %c0_4] : memref<1x32x128xf32, #tpu.memory_space<vmem>>, vector<1x32x128xf32>
    %3 = vector.shape_cast %2 : vector<1x32x128xf32> to vector<32x128xf32>
    %c0_5 = arith.constant 0 : index
    %4 = memref.load %arg7[%c0_5] : memref<1xf32, #tpu.memory_space<smem>>
    %c0_6 = arith.constant 0 : index
    %c0_7 = arith.constant 0 : index
    %5 = vector.load %arg3[%c0_6, %c0_7] : memref<48x16xbf16, #tpu.memory_space<vmem>>, vector<48x16xbf16>
    %6 = arith.truncf %1 : vector<16x128xf32> to vector<16x128xbf16>
    %cst = arith.constant dense<0.000000e+00> : vector<48x128xf32>
    %7 = tpu.matmul %5, %6, %cst {dimension_numbers = #tpu.dot_dimension_numbers<[1], [0], [0], [1], [0, 0, 1, 1], [], []>} : vector<48x16xbf16>, vector<16x128xbf16>, vector<48x128xf32> -> vector<48x128xf32>
    %c0_8 = arith.constant 0 : index
    %c0_9 = arith.constant 0 : index
    %8 = vector.load %arg4[%c0_8, %c0_9] : memref<48x1xf32, #tpu.memory_space<vmem>>, vector<48x1xf32>
    %9 = vector.broadcast %8 : vector<48x1xf32> to vector<48x128xf32>
    %10 = arith.addf %7, %9 : vector<48x128xf32>
    %c0_10 = arith.constant 0 : index
    %c0_11 = arith.constant 0 : index
    %11 = vector.load %arg5[%c0_10, %c0_11] : memref<96x32xbf16, #tpu.memory_space<vmem>>, vector<96x32xbf16>
    %12 = arith.truncf %3 : vector<32x128xf32> to vector<32x128xbf16>
    %cst_12 = arith.constant dense<0.000000e+00> : vector<96x128xf32>
    %13 = tpu.matmul %11, %12, %cst_12 {dimension_numbers = #tpu.dot_dimension_numbers<[1], [0], [0], [1], [0, 0, 1, 1], [], []>} : vector<96x32xbf16>, vector<32x128xbf16>, vector<96x128xf32> -> vector<96x128xf32>
    %c0_13 = arith.constant 0 : index
    %c0_14 = arith.constant 0 : index
    %14 = vector.load %arg6[%c0_13, %c0_14] : memref<96x1xf32, #tpu.memory_space<vmem>>, vector<96x1xf32>
    %15 = vector.broadcast %14 : vector<96x1xf32> to vector<96x128xf32>
    %16 = arith.addf %13, %15 : vector<96x128xf32>
    %17 = vector.extract_strided_slice %10 {offsets = [0, 0], sizes = [16, 128], strides = [1, 1]} : vector<48x128xf32> to vector<16x128xf32>
    %18 = vector.extract_strided_slice %10 {offsets = [16, 0], sizes = [16, 128], strides = [1, 1]} : vector<48x128xf32> to vector<16x128xf32>
    %19 = vector.extract_strided_slice %16 {offsets = [64, 0], sizes = [32, 128], strides = [1, 1]} : vector<96x128xf32> to vector<32x128xf32>
    %cst_15 = arith.constant dense<0xFF800000> : vector<16xf32>
    %20 = vector.multi_reduction <maximumf>, %17, %cst_15 [1] : vector<16x128xf32> to vector<16xf32>
    %21 = vector.shape_cast %20 : vector<16xf32> to vector<16x1xf32>
    %22 = vector.broadcast %21 : vector<16x1xf32> to vector<16x128xf32>
    %23 = arith.subf %17, %22 : vector<16x128xf32>
    %24 = math.exp %23 : vector<16x128xf32>
    %25 = tpu.iota {dimensions = array<i32: 1>} : vector<16x128xi32>
    %c64_i32 = arith.constant 64 : i32
    %26 = vector.broadcast %c64_i32 : i32 to vector<16x128xi32>
    %27 = arith.cmpi slt, %25, %26 : vector<16x128xi32>
    %cst_16 = arith.constant 0.000000e+00 : f32
    %28 = vector.broadcast %cst_16 : f32 to vector<16x128xf32>
    %29 = arith.select %27, %24, %28 : vector<16x128xi1>, vector<16x128xf32>
    %cst_17 = arith.constant dense<0.000000e+00> : vector<16xf32>
    %30 = vector.multi_reduction <add>, %29, %cst_17 [1] : vector<16x128xf32> to vector<16xf32>
    %31 = vector.shape_cast %30 : vector<16xf32> to vector<16x1xf32>
    %32 = tpu.reciprocal %31 : vector<16x1xf32> -> vector<16x1xf32>
    %33 = vector.broadcast %32 : vector<16x1xf32> to vector<16x128xf32>
    %34 = arith.mulf %29, %33 : vector<16x128xf32>
    %35 = vector.extract_strided_slice %34 {offsets = [0, 0], sizes = [4, 128], strides = [1, 1]} : vector<16x128xf32> to vector<4x128xf32>
    %36 = vector.extract_strided_slice %18 {offsets = [0, 0], sizes = [4, 128], strides = [1, 1]} : vector<16x128xf32> to vector<4x128xf32>
    %cst_18 = arith.constant dense<0xFF800000> : vector<128xf32>
    %37 = vector.multi_reduction <maximumf>, %36, %cst_18 [0] : vector<4x128xf32> to vector<128xf32>
    %38 = vector.shape_cast %37 : vector<128xf32> to vector<1x128xf32>
    %39 = vector.broadcast %38 : vector<1x128xf32> to vector<4x128xf32>
    %40 = arith.subf %36, %39 : vector<4x128xf32>
    %41 = math.exp %40 : vector<4x128xf32>
    %cst_19 = arith.constant dense<0.000000e+00> : vector<128xf32>
    %42 = vector.multi_reduction <add>, %41, %cst_19 [0] : vector<4x128xf32> to vector<128xf32>
    %43 = vector.shape_cast %42 : vector<128xf32> to vector<1x128xf32>
    %44 = tpu.reciprocal %43 : vector<1x128xf32> -> vector<1x128xf32>
    %45 = vector.broadcast %44 : vector<1x128xf32> to vector<4x128xf32>
    %46 = arith.mulf %41, %45 : vector<4x128xf32>
    %47 = vector.extract_strided_slice %19 {offsets = [0, 0], sizes = [8, 128], strides = [1, 1]} : vector<32x128xf32> to vector<8x128xf32>
    %cst_20 = arith.constant dense<0.000000e+00> : vector<4x8xf32>
    %48 = tpu.matmul %35, %47, %cst_20 {dimension_numbers = #tpu.dot_dimension_numbers<[1], [1], [0], [0], [0, 0, 1, 0], [], []>} : vector<4x128xf32>, vector<8x128xf32>, vector<4x8xf32> -> vector<4x8xf32>
    %cst_21 = arith.constant dense<0.000000e+00> : vector<8x128xf32>
    %49 = tpu.matmul %48, %46, %cst_21 {dimension_numbers = #tpu.dot_dimension_numbers<[0], [0], [1], [1], [0, 1, 1, 1], [], []>} : vector<4x8xf32>, vector<4x128xf32>, vector<8x128xf32> -> vector<8x128xf32>
    %50 = vector.extract_strided_slice %3 {offsets = [0, 0], sizes = [8, 128], strides = [1, 1]} : vector<32x128xf32> to vector<8x128xf32>
    %51 = vector.broadcast %4 : f32 to vector<8x128xf32>
    %52 = arith.mulf %49, %51 : vector<8x128xf32>
    %53 = arith.addf %50, %52 : vector<8x128xf32>
    %c0_22 = arith.constant 0 : index
    %c0_23 = arith.constant 0 : index
    %c0_24 = arith.constant 0 : index
    %54 = vector.load %arg9[%c0_22, %c0_23, %c0_24] : memref<1x32x128xf32, #tpu.memory_space<vmem>>, vector<1x8x128xf32>
    %55 = vector.shape_cast %54 : vector<1x8x128xf32> to vector<8x128xf32>
    %56 = vector.shape_cast %53 : vector<8x128xf32> to vector<1x8x128xf32>
    tpu.vector_store %arg9[%c0_22, %c0_23, %c0_24], %56 {strides = array<i32>} : memref<1x32x128xf32, #tpu.memory_space<vmem>>, vector<1x8x128xf32>,
    %57 = vector.extract_strided_slice %34 {offsets = [4, 0], sizes = [4, 128], strides = [1, 1]} : vector<16x128xf32> to vector<4x128xf32>
    %58 = vector.extract_strided_slice %18 {offsets = [4, 0], sizes = [4, 128], strides = [1, 1]} : vector<16x128xf32> to vector<4x128xf32>
    %cst_25 = arith.constant dense<0xFF800000> : vector<128xf32>
    %59 = vector.multi_reduction <maximumf>, %58, %cst_25 [0] : vector<4x128xf32> to vector<128xf32>
    %60 = vector.shape_cast %59 : vector<128xf32> to vector<1x128xf32>
    %61 = vector.broadcast %60 : vector<1x128xf32> to vector<4x128xf32>
    %62 = arith.subf %58, %61 : vector<4x128xf32>
    %63 = math.exp %62 : vector<4x128xf32>
    %cst_26 = arith.constant dense<0.000000e+00> : vector<128xf32>
    %64 = vector.multi_reduction <add>, %63, %cst_26 [0] : vector<4x128xf32> to vector<128xf32>
    %65 = vector.shape_cast %64 : vector<128xf32> to vector<1x128xf32>
    %66 = tpu.reciprocal %65 : vector<1x128xf32> -> vector<1x128xf32>
    %67 = vector.broadcast %66 : vector<1x128xf32> to vector<4x128xf32>
    %68 = arith.mulf %63, %67 : vector<4x128xf32>
    %69 = vector.extract_strided_slice %19 {offsets = [8, 0], sizes = [8, 128], strides = [1, 1]} : vector<32x128xf32> to vector<8x128xf32>
    %cst_27 = arith.constant dense<0.000000e+00> : vector<4x8xf32>
    %70 = tpu.matmul %57, %69, %cst_27 {dimension_numbers = #tpu.dot_dimension_numbers<[1], [1], [0], [0], [0, 0, 1, 0], [], []>} : vector<4x128xf32>, vector<8x128xf32>, vector<4x8xf32> -> vector<4x8xf32>
    %cst_28 = arith.constant dense<0.000000e+00> : vector<8x128xf32>
    %71 = tpu.matmul %70, %68, %cst_28 {dimension_numbers = #tpu.dot_dimension_numbers<[0], [0], [1], [1], [0, 1, 1, 1], [], []>} : vector<4x8xf32>, vector<4x128xf32>, vector<8x128xf32> -> vector<8x128xf32>
    %72 = vector.extract_strided_slice %3 {offsets = [8, 0], sizes = [8, 128], strides = [1, 1]} : vector<32x128xf32> to vector<8x128xf32>
    %73 = vector.broadcast %4 : f32 to vector<8x128xf32>
    %74 = arith.mulf %71, %73 : vector<8x128xf32>
    %75 = arith.addf %72, %74 : vector<8x128xf32>
    %c0_29 = arith.constant 0 : index
    %c8 = arith.constant 8 : index
    %c0_30 = arith.constant 0 : index
    %76 = vector.load %arg9[%c0_29, %c8, %c0_30] : memref<1x32x128xf32, #tpu.memory_space<vmem>>, vector<1x8x128xf32>
    %77 = vector.shape_cast %76 : vector<1x8x128xf32> to vector<8x128xf32>
    %78 = vector.shape_cast %75 : vector<8x128xf32> to vector<1x8x128xf32>
    tpu.vector_store %arg9[%c0_29, %c8, %c0_30], %78 {strides = array<i32>} : memref<1x32x128xf32, #tpu.memory_space<vmem>>, vector<1x8x128xf32>,
    %79 = vector.extract_strided_slice %34 {offsets = [8, 0], sizes = [4, 128], strides = [1, 1]} : vector<16x128xf32> to vector<4x128xf32>
    %80 = vector.extract_strided_slice %18 {offsets = [8, 0], sizes = [4, 128], strides = [1, 1]} : vector<16x128xf32> to vector<4x128xf32>
    %cst_31 = arith.constant dense<0xFF800000> : vector<128xf32>
    %81 = vector.multi_reduction <maximumf>, %80, %cst_31 [0] : vector<4x128xf32> to vector<128xf32>
    %82 = vector.shape_cast %81 : vector<128xf32> to vector<1x128xf32>
    %83 = vector.broadcast %82 : vector<1x128xf32> to vector<4x128xf32>
    %84 = arith.subf %80, %83 : vector<4x128xf32>
    %85 = math.exp %84 : vector<4x128xf32>
    %cst_32 = arith.constant dense<0.000000e+00> : vector<128xf32>
    %86 = vector.multi_reduction <add>, %85, %cst_32 [0] : vector<4x128xf32> to vector<128xf32>
    %87 = vector.shape_cast %86 : vector<128xf32> to vector<1x128xf32>
    %88 = tpu.reciprocal %87 : vector<1x128xf32> -> vector<1x128xf32>
    %89 = vector.broadcast %88 : vector<1x128xf32> to vector<4x128xf32>
    %90 = arith.mulf %85, %89 : vector<4x128xf32>
    %91 = vector.extract_strided_slice %19 {offsets = [16, 0], sizes = [8, 128], strides = [1, 1]} : vector<32x128xf32> to vector<8x128xf32>
    %cst_33 = arith.constant dense<0.000000e+00> : vector<4x8xf32>
    %92 = tpu.matmul %79, %91, %cst_33 {dimension_numbers = #tpu.dot_dimension_numbers<[1], [1], [0], [0], [0, 0, 1, 0], [], []>} : vector<4x128xf32>, vector<8x128xf32>, vector<4x8xf32> -> vector<4x8xf32>
    %cst_34 = arith.constant dense<0.000000e+00> : vector<8x128xf32>
    %93 = tpu.matmul %92, %90, %cst_34 {dimension_numbers = #tpu.dot_dimension_numbers<[0], [0], [1], [1], [0, 1, 1, 1], [], []>} : vector<4x8xf32>, vector<4x128xf32>, vector<8x128xf32> -> vector<8x128xf32>
    %94 = vector.extract_strided_slice %3 {offsets = [16, 0], sizes = [8, 128], strides = [1, 1]} : vector<32x128xf32> to vector<8x128xf32>
    %95 = vector.broadcast %4 : f32 to vector<8x128xf32>
    %96 = arith.mulf %93, %95 : vector<8x128xf32>
    %97 = arith.addf %94, %96 : vector<8x128xf32>
    %c0_35 = arith.constant 0 : index
    %c16 = arith.constant 16 : index
    %c0_36 = arith.constant 0 : index
    %98 = vector.load %arg9[%c0_35, %c16, %c0_36] : memref<1x32x128xf32, #tpu.memory_space<vmem>>, vector<1x8x128xf32>
    %99 = vector.shape_cast %98 : vector<1x8x128xf32> to vector<8x128xf32>
    %100 = vector.shape_cast %97 : vector<8x128xf32> to vector<1x8x128xf32>
    tpu.vector_store %arg9[%c0_35, %c16, %c0_36], %100 {strides = array<i32>} : memref<1x32x128xf32, #tpu.memory_space<vmem>>, vector<1x8x128xf32>,
    %101 = vector.extract_strided_slice %34 {offsets = [12, 0], sizes = [4, 128], strides = [1, 1]} : vector<16x128xf32> to vector<4x128xf32>
    %102 = vector.extract_strided_slice %18 {offsets = [12, 0], sizes = [4, 128], strides = [1, 1]} : vector<16x128xf32> to vector<4x128xf32>
    %cst_37 = arith.constant dense<0xFF800000> : vector<128xf32>
    %103 = vector.multi_reduction <maximumf>, %102, %cst_37 [0] : vector<4x128xf32> to vector<128xf32>
    %104 = vector.shape_cast %103 : vector<128xf32> to vector<1x128xf32>
    %105 = vector.broadcast %104 : vector<1x128xf32> to vector<4x128xf32>
    %106 = arith.subf %102, %105 : vector<4x128xf32>
    %107 = math.exp %106 : vector<4x128xf32>
    %cst_38 = arith.constant dense<0.000000e+00> : vector<128xf32>
    %108 = vector.multi_reduction <add>, %107, %cst_38 [0] : vector<4x128xf32> to vector<128xf32>
    %109 = vector.shape_cast %108 : vector<128xf32> to vector<1x128xf32>
    %110 = tpu.reciprocal %109 : vector<1x128xf32> -> vector<1x128xf32>
    %111 = vector.broadcast %110 : vector<1x128xf32> to vector<4x128xf32>
    %112 = arith.mulf %107, %111 : vector<4x128xf32>
    %113 = vector.extract_strided_slice %19 {offsets = [24, 0], sizes = [8, 128], strides = [1, 1]} : vector<32x128xf32> to vector<8x128xf32>
    %cst_39 = arith.constant dense<0.000000e+00> : vector<4x8xf32>
    %114 = tpu.matmul %101, %113, %cst_39 {dimension_numbers = #tpu.dot_dimension_numbers<[1], [1], [0], [0], [0, 0, 1, 0], [], []>} : vector<4x128xf32>, vector<8x128xf32>, vector<4x8xf32> -> vector<4x8xf32>
    %cst_40 = arith.constant dense<0.000000e+00> : vector<8x128xf32>
    %115 = tpu.matmul %114, %112, %cst_40 {dimension_numbers = #tpu.dot_dimension_numbers<[0], [0], [1], [1], [0, 1, 1, 1], [], []>} : vector<4x8xf32>, vector<4x128xf32>, vector<8x128xf32> -> vector<8x128xf32>
    %116 = vector.extract_strided_slice %3 {offsets = [24, 0], sizes = [8, 128], strides = [1, 1]} : vector<32x128xf32> to vector<8x128xf32>
    %117 = vector.broadcast %4 : f32 to vector<8x128xf32>
    %118 = arith.mulf %115, %117 : vector<8x128xf32>
    %119 = arith.addf %116, %118 : vector<8x128xf32>
    %c0_41 = arith.constant 0 : index
    %c24 = arith.constant 24 : index
    %c0_42 = arith.constant 0 : index
    %120 = vector.load %arg9[%c0_41, %c24, %c0_42] : memref<1x32x128xf32, #tpu.memory_space<vmem>>, vector<1x8x128xf32>
    %121 = vector.shape_cast %120 : vector<1x8x128xf32> to vector<8x128xf32>
    %122 = vector.shape_cast %119 : vector<8x128xf32> to vector<1x8x128xf32>
    tpu.vector_store %arg9[%c0_41, %c24, %c0_42], %122 {strides = array<i32>} : memref<1x32x128xf32, #tpu.memory_space<vmem>>, vector<1x8x128xf32>,
    %123 = vector.extract_strided_slice %16 {offsets = [0, 0], sizes = [32, 128], strides = [1, 1]} : vector<96x128xf32> to vector<32x128xf32>
    %124 = vector.extract_strided_slice %16 {offsets = [32, 0], sizes = [32, 128], strides = [1, 1]} : vector<96x128xf32> to vector<32x128xf32>
    %125 = vector.extract_strided_slice %10 {offsets = [32, 0], sizes = [16, 128], strides = [1, 1]} : vector<48x128xf32> to vector<16x128xf32>
    %cst_43 = arith.constant dense<0xFF800000> : vector<32xf32>
    %126 = vector.multi_reduction <maximumf>, %123, %cst_43 [1] : vector<32x128xf32> to vector<32xf32>
    %127 = vector.shape_cast %126 : vector<32xf32> to vector<32x1xf32>
    %128 = vector.broadcast %127 : vector<32x1xf32> to vector<32x128xf32>
    %129 = arith.subf %123, %128 : vector<32x128xf32>
    %130 = math.exp %129 : vector<32x128xf32>
    %131 = tpu.iota {dimensions = array<i32: 1>} : vector<32x128xi32>
    %c64_i32_44 = arith.constant 64 : i32
    %132 = vector.broadcast %c64_i32_44 : i32 to vector<32x128xi32>
    %133 = arith.cmpi slt, %131, %132 : vector<32x128xi32>
    %cst_45 = arith.constant 0.000000e+00 : f32
    %134 = vector.broadcast %cst_45 : f32 to vector<32x128xf32>
    %135 = arith.select %133, %130, %134 : vector<32x128xi1>, vector<32x128xf32>
    %cst_46 = arith.constant dense<0.000000e+00> : vector<32xf32>
    %136 = vector.multi_reduction <add>, %135, %cst_46 [1] : vector<32x128xf32> to vector<32xf32>
    %137 = vector.shape_cast %136 : vector<32xf32> to vector<32x1xf32>
    %138 = tpu.reciprocal %137 : vector<32x1xf32> -> vector<32x1xf32>
    %139 = vector.broadcast %138 : vector<32x1xf32> to vector<32x128xf32>
    %140 = arith.mulf %135, %139 : vector<32x128xf32>
    %141 = vector.extract_strided_slice %140 {offsets = [0, 0], sizes = [8, 128], strides = [1, 1]} : vector<32x128xf32> to vector<8x128xf32>
    %142 = vector.extract_strided_slice %124 {offsets = [0, 0], sizes = [8, 128], strides = [1, 1]} : vector<32x128xf32> to vector<8x128xf32>
    %cst_47 = arith.constant dense<0xFF800000> : vector<128xf32>
    %143 = vector.multi_reduction <maximumf>, %142, %cst_47 [0] : vector<8x128xf32> to vector<128xf32>
    %144 = vector.shape_cast %143 : vector<128xf32> to vector<1x128xf32>
    %145 = vector.broadcast %144 : vector<1x128xf32> to vector<8x128xf32>
    %146 = arith.subf %142, %145 : vector<8x128xf32>
    %147 = math.exp %146 : vector<8x128xf32>
    %cst_48 = arith.constant dense<0.000000e+00> : vector<128xf32>
    %148 = vector.multi_reduction <add>, %147, %cst_48 [0] : vector<8x128xf32> to vector<128xf32>
    %149 = vector.shape_cast %148 : vector<128xf32> to vector<1x128xf32>
    %150 = tpu.reciprocal %149 : vector<1x128xf32> -> vector<1x128xf32>
    %151 = vector.broadcast %150 : vector<1x128xf32> to vector<8x128xf32>
    %152 = arith.mulf %147, %151 : vector<8x128xf32>
    %153 = vector.extract_strided_slice %125 {offsets = [0, 0], sizes = [4, 128], strides = [1, 1]} : vector<16x128xf32> to vector<4x128xf32>
    %cst_49 = arith.constant dense<0.000000e+00> : vector<8x4xf32>
    %154 = tpu.matmul %141, %153, %cst_49 {dimension_numbers = #tpu.dot_dimension_numbers<[1], [1], [0], [0], [0, 0, 1, 0], [], []>} : vector<8x128xf32>, vector<4x128xf32>, vector<8x4xf32> -> vector<8x4xf32>
    %cst_50 = arith.constant dense<0.000000e+00> : vector<4x128xf32>
    %155 = tpu.matmul %154, %152, %cst_50 {dimension_numbers = #tpu.dot_dimension_numbers<[0], [0], [1], [1], [0, 1, 1, 1], [], []>} : vector<8x4xf32>, vector<8x128xf32>, vector<4x128xf32> -> vector<4x128xf32>
    %156 = vector.extract_strided_slice %1 {offsets = [0, 0], sizes = [4, 128], strides = [1, 1]} : vector<16x128xf32> to vector<4x128xf32>
    %157 = vector.broadcast %4 : f32 to vector<4x128xf32>
    %158 = arith.mulf %155, %157 : vector<4x128xf32>
    %159 = arith.addf %156, %158 : vector<4x128xf32>
    %c0_51 = arith.constant 0 : index
    %c0_52 = arith.constant 0 : index
    %c0_53 = arith.constant 0 : index
    %160 = vector.load %arg8[%c0_51, %c0_52, %c0_53] : memref<1x16x128xf32, #tpu.memory_space<vmem>>, vector<1x4x128xf32>
    %161 = vector.shape_cast %160 : vector<1x4x128xf32> to vector<4x128xf32>
    %162 = vector.shape_cast %159 : vector<4x128xf32> to vector<1x4x128xf32>
    tpu.vector_store %arg8[%c0_51, %c0_52, %c0_53], %162 {strides = array<i32>} : memref<1x16x128xf32, #tpu.memory_space<vmem>>, vector<1x4x128xf32>,
    %163 = vector.extract_strided_slice %140 {offsets = [8, 0], sizes = [8, 128], strides = [1, 1]} : vector<32x128xf32> to vector<8x128xf32>
    %164 = vector.extract_strided_slice %124 {offsets = [8, 0], sizes = [8, 128], strides = [1, 1]} : vector<32x128xf32> to vector<8x128xf32>
    %cst_54 = arith.constant dense<0xFF800000> : vector<128xf32>
    %165 = vector.multi_reduction <maximumf>, %164, %cst_54 [0] : vector<8x128xf32> to vector<128xf32>
    %166 = vector.shape_cast %165 : vector<128xf32> to vector<1x128xf32>
    %167 = vector.broadcast %166 : vector<1x128xf32> to vector<8x128xf32>
    %168 = arith.subf %164, %167 : vector<8x128xf32>
    %169 = math.exp %168 : vector<8x128xf32>
    %cst_55 = arith.constant dense<0.000000e+00> : vector<128xf32>
    %170 = vector.multi_reduction <add>, %169, %cst_55 [0] : vector<8x128xf32> to vector<128xf32>
    %171 = vector.shape_cast %170 : vector<128xf32> to vector<1x128xf32>
    %172 = tpu.reciprocal %171 : vector<1x128xf32> -> vector<1x128xf32>
    %173 = vector.broadcast %172 : vector<1x128xf32> to vector<8x128xf32>
    %174 = arith.mulf %169, %173 : vector<8x128xf32>
    %175 = vector.extract_strided_slice %125 {offsets = [4, 0], sizes = [4, 128], strides = [1, 1]} : vector<16x128xf32> to vector<4x128xf32>
    %cst_56 = arith.constant dense<0.000000e+00> : vector<8x4xf32>
    %176 = tpu.matmul %163, %175, %cst_56 {dimension_numbers = #tpu.dot_dimension_numbers<[1], [1], [0], [0], [0, 0, 1, 0], [], []>} : vector<8x128xf32>, vector<4x128xf32>, vector<8x4xf32> -> vector<8x4xf32>
    %cst_57 = arith.constant dense<0.000000e+00> : vector<4x128xf32>
    %177 = tpu.matmul %176, %174, %cst_57 {dimension_numbers = #tpu.dot_dimension_numbers<[0], [0], [1], [1], [0, 1, 1, 1], [], []>} : vector<8x4xf32>, vector<8x128xf32>, vector<4x128xf32> -> vector<4x128xf32>
    %178 = vector.extract_strided_slice %1 {offsets = [4, 0], sizes = [4, 128], strides = [1, 1]} : vector<16x128xf32> to vector<4x128xf32>
    %179 = vector.broadcast %4 : f32 to vector<4x128xf32>
    %180 = arith.mulf %177, %179 : vector<4x128xf32>
    %181 = arith.addf %178, %180 : vector<4x128xf32>
    %c0_58 = arith.constant 0 : index
    %c4 = arith.constant 4 : index
    %c0_59 = arith.constant 0 : index
    %182 = vector.load %arg8[%c0_58, %c4, %c0_59] : memref<1x16x128xf32, #tpu.memory_space<vmem>>, vector<1x4x128xf32>
    %183 = vector.shape_cast %182 : vector<1x4x128xf32> to vector<4x128xf32>
    %184 = vector.shape_cast %181 : vector<4x128xf32> to vector<1x4x128xf32>
    tpu.vector_store %arg8[%c0_58, %c4, %c0_59], %184 {strides = array<i32>} : memref<1x16x128xf32, #tpu.memory_space<vmem>>, vector<1x4x128xf32>,
    %185 = vector.extract_strided_slice %140 {offsets = [16, 0], sizes = [8, 128], strides = [1, 1]} : vector<32x128xf32> to vector<8x128xf32>
    %186 = vector.extract_strided_slice %124 {offsets = [16, 0], sizes = [8, 128], strides = [1, 1]} : vector<32x128xf32> to vector<8x128xf32>
    %cst_60 = arith.constant dense<0xFF800000> : vector<128xf32>
    %187 = vector.multi_reduction <maximumf>, %186, %cst_60 [0] : vector<8x128xf32> to vector<128xf32>
    %188 = vector.shape_cast %187 : vector<128xf32> to vector<1x128xf32>
    %189 = vector.broadcast %188 : vector<1x128xf32> to vector<8x128xf32>
    %190 = arith.subf %186, %189 : vector<8x128xf32>
    %191 = math.exp %190 : vector<8x128xf32>
    %cst_61 = arith.constant dense<0.000000e+00> : vector<128xf32>
    %192 = vector.multi_reduction <add>, %191, %cst_61 [0] : vector<8x128xf32> to vector<128xf32>
    %193 = vector.shape_cast %192 : vector<128xf32> to vector<1x128xf32>
    %194 = tpu.reciprocal %193 : vector<1x128xf32> -> vector<1x128xf32>
    %195 = vector.broadcast %194 : vector<1x128xf32> to vector<8x128xf32>
    %196 = arith.mulf %191, %195 : vector<8x128xf32>
    %197 = vector.extract_strided_slice %125 {offsets = [8, 0], sizes = [4, 128], strides = [1, 1]} : vector<16x128xf32> to vector<4x128xf32>
    %cst_62 = arith.constant dense<0.000000e+00> : vector<8x4xf32>
    %198 = tpu.matmul %185, %197, %cst_62 {dimension_numbers = #tpu.dot_dimension_numbers<[1], [1], [0], [0], [0, 0, 1, 0], [], []>} : vector<8x128xf32>, vector<4x128xf32>, vector<8x4xf32> -> vector<8x4xf32>
    %cst_63 = arith.constant dense<0.000000e+00> : vector<4x128xf32>
    %199 = tpu.matmul %198, %196, %cst_63 {dimension_numbers = #tpu.dot_dimension_numbers<[0], [0], [1], [1], [0, 1, 1, 1], [], []>} : vector<8x4xf32>, vector<8x128xf32>, vector<4x128xf32> -> vector<4x128xf32>
    %200 = vector.extract_strided_slice %1 {offsets = [8, 0], sizes = [4, 128], strides = [1, 1]} : vector<16x128xf32> to vector<4x128xf32>
    %201 = vector.broadcast %4 : f32 to vector<4x128xf32>
    %202 = arith.mulf %199, %201 : vector<4x128xf32>
    %203 = arith.addf %200, %202 : vector<4x128xf32>
    %c0_64 = arith.constant 0 : index
    %c8_65 = arith.constant 8 : index
    %c0_66 = arith.constant 0 : index
    %204 = vector.load %arg8[%c0_64, %c8_65, %c0_66] : memref<1x16x128xf32, #tpu.memory_space<vmem>>, vector<1x4x128xf32>
    %205 = vector.shape_cast %204 : vector<1x4x128xf32> to vector<4x128xf32>
    %206 = vector.shape_cast %203 : vector<4x128xf32> to vector<1x4x128xf32>
    tpu.vector_store %arg8[%c0_64, %c8_65, %c0_66], %206 {strides = array<i32>} : memref<1x16x128xf32, #tpu.memory_space<vmem>>, vector<1x4x128xf32>,
    %207 = vector.extract_strided_slice %140 {offsets = [24, 0], sizes = [8, 128], strides = [1, 1]} : vector<32x128xf32> to vector<8x128xf32>
    %208 = vector.extract_strided_slice %124 {offsets = [24, 0], sizes = [8, 128], strides = [1, 1]} : vector<32x128xf32> to vector<8x128xf32>
    %cst_67 = arith.constant dense<0xFF800000> : vector<128xf32>
    %209 = vector.multi_reduction <maximumf>, %208, %cst_67 [0] : vector<8x128xf32> to vector<128xf32>
    %210 = vector.shape_cast %209 : vector<128xf32> to vector<1x128xf32>
    %211 = vector.broadcast %210 : vector<1x128xf32> to vector<8x128xf32>
    %212 = arith.subf %208, %211 : vector<8x128xf32>
    %213 = math.exp %212 : vector<8x128xf32>
    %cst_68 = arith.constant dense<0.000000e+00> : vector<128xf32>
    %214 = vector.multi_reduction <add>, %213, %cst_68 [0] : vector<8x128xf32> to vector<128xf32>
    %215 = vector.shape_cast %214 : vector<128xf32> to vector<1x128xf32>
    %216 = tpu.reciprocal %215 : vector<1x128xf32> -> vector<1x128xf32>
    %217 = vector.broadcast %216 : vector<1x128xf32> to vector<8x128xf32>
    %218 = arith.mulf %213, %217 : vector<8x128xf32>
    %219 = vector.extract_strided_slice %125 {offsets = [12, 0], sizes = [4, 128], strides = [1, 1]} : vector<16x128xf32> to vector<4x128xf32>
    %cst_69 = arith.constant dense<0.000000e+00> : vector<8x4xf32>
    %220 = tpu.matmul %207, %219, %cst_69 {dimension_numbers = #tpu.dot_dimension_numbers<[1], [1], [0], [0], [0, 0, 1, 0], [], []>} : vector<8x128xf32>, vector<4x128xf32>, vector<8x4xf32> -> vector<8x4xf32>
    %cst_70 = arith.constant dense<0.000000e+00> : vector<4x128xf32>
    %221 = tpu.matmul %220, %218, %cst_70 {dimension_numbers = #tpu.dot_dimension_numbers<[0], [0], [1], [1], [0, 1, 1, 1], [], []>} : vector<8x4xf32>, vector<8x128xf32>, vector<4x128xf32> -> vector<4x128xf32>
    %222 = vector.extract_strided_slice %1 {offsets = [12, 0], sizes = [4, 128], strides = [1, 1]} : vector<16x128xf32> to vector<4x128xf32>
    %223 = vector.broadcast %4 : f32 to vector<4x128xf32>
    %224 = arith.mulf %221, %223 : vector<4x128xf32>
    %225 = arith.addf %222, %224 : vector<4x128xf32>
    %c0_71 = arith.constant 0 : index
    %c12 = arith.constant 12 : index
    %c0_72 = arith.constant 0 : index
    %226 = vector.load %arg8[%c0_71, %c12, %c0_72] : memref<1x16x128xf32, #tpu.memory_space<vmem>>, vector<1x4x128xf32>
    %227 = vector.shape_cast %226 : vector<1x4x128xf32> to vector<4x128xf32>
    %228 = vector.shape_cast %225 : vector<4x128xf32> to vector<1x4x128xf32>
    tpu.vector_store %arg8[%c0_71, %c12, %c0_72], %228 {strides = array<i32>} : memref<1x16x128xf32, #tpu.memory_space<vmem>>, vector<1x4x128xf32>,
    return
  }
  func.func @transform_0(%arg0: i32) -> (i32, i32, i32) {
    %c0_i32 = arith.constant 0 : i32
    %c0_i32_0 = arith.constant 0 : i32
    %c0_i32_1 = arith.constant 0 : i32
    return %arg0, %c0_i32, %c0_i32_0 : i32, i32, i32
  }
  func.func @transform_1(%arg0: i32) -> (i32, i32, i32) {
    %c0_i32 = arith.constant 0 : i32
    %c0_i32_0 = arith.constant 0 : i32
    %c0_i32_1 = arith.constant 0 : i32
    return %arg0, %c0_i32, %c0_i32_0 : i32, i32, i32
  }
  func.func @transform_2(%arg0: i32) -> (i32, i32) {
    %c0_i32 = arith.constant 0 : i32
    %c0_i32_0 = arith.constant 0 : i32
    %c0_i32_1 = arith.constant 0 : i32
    return %c0_i32, %c0_i32_0 : i32, i32
  }
  func.func @transform_3(%arg0: i32) -> (i32, i32) {
    %c0_i32 = arith.constant 0 : i32
    %c0_i32_0 = arith.constant 0 : i32
    %c0_i32_1 = arith.constant 0 : i32
    return %c0_i32, %c0_i32_0 : i32, i32
  }
  func.func @transform_4(%arg0: i32) -> (i32, i32) {
    %c0_i32 = arith.constant 0 : i32
    %c0_i32_0 = arith.constant 0 : i32
    %c0_i32_1 = arith.constant 0 : i32
    return %c0_i32, %c0_i32_0 : i32, i32
  }
  func.func @transform_5(%arg0: i32) -> (i32, i32) {
    %c0_i32 = arith.constant 0 : i32
    %c0_i32_0 = arith.constant 0 : i32
    %c0_i32_1 = arith.constant 0 : i32
    return %c0_i32, %c0_i32_0 : i32, i32
  }
  func.func @transform_6(%arg0: i32) -> i32 {
    %c0_i32 = arith.constant 0 : i32
    %c0_i32_0 = arith.constant 0 : i32
    return %c0_i32 : i32
  }
  func.func @transform_7(%arg0: i32) -> (i32, i32, i32) {
    %c0_i32 = arith.constant 0 : i32
    %c0_i32_0 = arith.constant 0 : i32
    %c0_i32_1 = arith.constant 0 : i32
    return %arg0, %c0_i32, %c0_i32_0 : i32, i32, i32
  }
  func.func @transform_8(%arg0: i32) -> (i32, i32, i32) {
    %c0_i32 = arith.constant 0 : i32
    %c0_i32_0 = arith.constant 0 : i32
    %c0_i32_1 = arith.constant 0 : i32
    return %arg0, %c0_i32, %c0_i32_0 : i32, i32, i32
  }
}

</mosaic_0001>

<bundles_post_ra>
// kernel: tpu_custom_call.1
= control target key start
LH: loop header
LB: loop body
LE: loop exit
PB: predicated region body
PF: predicated region fallthrough
CT: control target
= control target key end

     0   :  { %s3408_s0 = inlined_call_operand.vmem [shape: f32[2,16,128], index: 0, kind: input, shape index: {}]   ;;  %s3409_s1 = inlined_call_operand.vmem [shape: f32[2,32,128], index: 1, kind: input, shape index: {}]   ;;  %s3410_s2 = inlined_call_operand.vmem [shape: bf16[48,16], index: 2, kind: input, shape index: {}]   ;;  %s3411_s3 = inlined_call_operand.vmem [shape: f32[48,1], index: 3, kind: input, shape index: {}]   ;;  %s3412_s4 = inlined_call_operand.vmem [shape: bf16[96,32], index: 4, kind: input, shape index: {}]   ;;  %s3413_s5 = inlined_call_operand.vmem [shape: f32[96,1], index: 5, kind: input, shape index: {}]   ;;  %s3414_s6 = inlined_call_operand.<no memory space> [shape: f32[1], index: 6, kind: input, shape index: {}]   ;;  %s3415_s7 = inlined_call_operand.hbm [shape: f32[2,16,128], index: 7, kind: output, shape index: {0}]   ;;  %s3416_s8 = inlined_call_operand.hbm [shape: f32[2,32,128], index: 8, kind: output, shape index: {1}]  }
   0x1   :  { %14 = sst [smem:[#allocation2]] %s3414_s6 }
   0x2   :  { %15 = vsyncpa [#allocation4], 0 }
   0x3   :  { %17 = vsyncpa [#allocation4 + $0x1], 0 }
   0x4   :  { %18 = vsyncpa [#allocation6], 0 }
   0x5   :  { %20 = vsyncpa [#allocation6 + $0x1], 0  ;;  %s2975_s29 = smov 0   ;;  %s2977_s30 = smov 0  }
   0x6   :  { %s2979_s9 = smov 0   ;;  %s2981_s10 = smov 0  }
   0x7 LB: > { %s2996_s6 = sadd.s32 4294967295, %s2918_s10   ;;  %s2500_s11 = sadd.s32 4294967294, %s2918_s10   ;;  %s2918_s10 = sphi %s2981_s10, %s3422_s10   ;;  %s2914_s9 = sphi %s2979_s9, %s3421_s9   ;;  %s2910_s30 = sphi %s2977_s30, %s3420_s30   ;;  %s2906_s29 = sphi %s2975_s29, %s3419_s29  }
   0x8   : > { %s3000_s12 = sadd.s32 1, %s2918_s10   ;;  %s190_s13 = sadd.s32 1, %s2914_s9 }
   0x9   : > { %s187_s14 = ssub.s32 %s2918_s10, %s3000_s12  ;;  %p200_p0 = scmp.ne.s32.totalorder %s2914_s9, %s2910_s30 }
   0xa   : > { %p188_p1 = scmp.eq.s32.totalorder %s187_s14, 0  ;;  %p201_p2 = scmp.eq.s32.totalorder %s2996_s6, 1 }
   0xb   : > { %p206_p3 = scmp.ne.s32.totalorder %s2910_s30, %s2906_s29  ;;  %p207_p4 = scmp.eq.s32.totalorder %s2500_s11, 1 }
   0xc   : > { %s3011_s15 = scalar_select %p188_p1, %s2914_s9, %s190_s13  }
   0xd   : > { %p3013_p5 = por %p201_p2, %p200_p0  ;;  %p3017_p6 = por %p207_p4, %p206_p3 }
   0xe   : > { %p2503_p7 = scmp.ge.s32.totalorder %s2918_s10, 1  ;;  %p282_p8 = scmp.lt.s32.totalorder %s2918_s10, 3 }
  0x10   : > { %p283_p9 = pnand %p2503_p7, %p282_p8 }
  0x11   : > { %p326_p10 = scmp.lt.s32.totalorder (!%p283_p9), %s2996_s6, 1  ;;  %v2920_v0 = vmov (!%p283_p9), 0.0   ;;  %vm2921_vm0 = vmmov (!%p283_p9), 0   ;;  %v2758_v1 = vld [vmem:[%s3412_s4] sm:$0xff] (!%p283_p9)   ;;  %vm585_vm1 = vcmask (!%p283_p9), 261120   ;;  %v2922_v3 = vmov (!%p283_p9), 0  }
  0x12   : > { %286 = sbr.rel (%p283_p9) target bundleno = 1171 (0x493), region = 48  ;;  %2596 = vmatprep.subr.bf16.mxu0 (!%p283_p9), %v2920_v0  ;;  %2598 = vmatprep.mubr.msk.bf16.mxu0 (!%p283_p9), %vm2921_vm0, %v2920_v0  ;;  %v351_v2 = vld [vmem:[%s3411_s3] sm:$0xff] (!%p283_p9)  ;;  %v352_v5 = vld [vmem:[%s3411_s3 + $0x8] sm:$0xff] (!%p283_p9)  ;;  %vm402_vm2 = vcmask (!%p283_p9), 130048   ;;  %v485_v17 = vld [vmem:[%s3413_s5 + $0x10] sm:$0xff] (!%p283_p9)  ;;  %vm708_vm4 = vcmask (!%p283_p9), 1043456  }
  0x13   : > { %2614 = vmatprep.mubr.msk.bf16.mxu1 (!%p283_p9), %vm585_vm1, %v2758_v1  ;;  %2755 = vset.pattern.permute.xlu0 (!%p283_p9), %v2922_v3  ;;  %v483_v4 = vld [vmem:[%s3413_s5] sm:$0xff] (!%p283_p9)  ;;  %v484_v6 = vld [vmem:[%s3413_s5 + $0x8] sm:$0xff] (!%p283_p9)  ;;  %v486_v18 = vld [vmem:[%s3413_s5 + $0x18] sm:$0xff] (!%p283_p9)  ;;  %v695_v1 = vlaneseq (!%p283_p9)  ;;  %vm911_vm5 = vcmask (!%p283_p9), 1047556   ;;  %vm830_vm6 = vcmask (!%p283_p9), 31744   ;;  %vm1685_vm7 = vcmask (!%p283_p9), 64512  }
  0x14   : > { %2756 = vset.pattern.permute.xlu1 (!%p283_p9), %v2922_v3  ;;  %359 = vperm.xlu0 (!%p283_p9), %2755, %v351_v2   ;;  %v2757_v15 = vld [vmem:[%s3410_s2] sm:$0xff] (!%p283_p9)   ;;  %v2759_v19 = vld [vmem:[%s3412_s4 + $0x8] sm:$0xff] (!%p283_p9)   ;;  %v2760_v20 = vld [vmem:[%s3412_s4 + $0x10] sm:$0xff] (!%p283_p9)   ;;  %s343_s28 = sld [smem:[#allocation2]] (!%p283_p9)  ;;  %s3299_s13 = sand.u32 (!%p283_p9), 1, %s2910_s30  }
  0x15   : > { %497 = vperm.xlu1 (!%p283_p9), %2756, %v483_v4   ;;  %v2761_v21 = vld [vmem:[%s3412_s4 + $0x18] sm:$0xff] (!%p283_p9)   ;;  %v2762_v22 = vld [vmem:[%s3412_s4 + $0x20] sm:$0xff] (!%p283_p9)   ;;  %v2763_v23 = vld [vmem:[%s3412_s4 + $0x28] sm:$0xff] (!%p283_p9)   ;;  %s2505_s14 = sshll.u32 (!%p283_p9), %s3299_s13, 5  ;;  %s2504_s21 = sshll.u32 (!%p283_p9), %s3299_s13, 4 }
  0x16   : > { %v2764_v24 = vld [vmem:[%s3410_s2 + $0x8] sm:$0xff] (!%p283_p9)   ;;  %v2765_v25 = vld [vmem:[%s3410_s2 + $0x10] sm:$0xff] (!%p283_p9)   ;;  %v491_v47 = vld [vmem:[%s3413_s5 + $0x40] sm:$0xff] (!%p283_p9)  ;;  %s2365_s25 = scalar_lea.sflag (!%p283_p9), [#allocation6], %s3299_s13  ;;  %s2923_s27 = smov (!%p283_p9), [#allocation5]  }
  0x17   : > { %v494_v52 = vld [vmem:[%s3413_s5 + $0x58] sm:$0xff] (!%p283_p9)  ;;  %v492_v56 = vld [vmem:[%s3413_s5 + $0x48] sm:$0xff] (!%p283_p9)  ;;  %v493_v57 = vld [vmem:[%s3413_s5 + $0x50] sm:$0xff] (!%p283_p9) }
  0x18   : > { %364 = vperm.xlu0 (!%p283_p9), %2755, %v352_v5  }
  0x19   : > { %s327_s20 = scalar_select %p326_p10, %s2996_s6, 1  ;;  %502 = vperm.xlu1 %2756, %v484_v6  }
  0x1b   : > { %s2548_s23 = sshll.u32 %s327_s20, 4  ;;  %s2549_s24 = sshll.u32 %s327_s20, 5 }
  0x1c   : > { %s3041_s11 = scalar_lea.vmem %s3408_s0, %s2548_s23  ;;  %s335_s18 = scalar_lea.vmem %s3409_s1, %s2549_s24  ;;  %507 = vperm.xlu0 %2755, %v485_v17  }
  0x1d   : > { %v337_v7 = vld [vmem:[%s3041_s11] sm:$0xff]  ;;  %v338_v8 = vld [vmem:[%s3041_s11 + $0x8] sm:$0xff]  ;;  %v3058_v12 = vld [vmem:[%s335_s18 + $0x10] sm:$0xff]  ;;  %512 = vperm.xlu1 %2756, %v486_v18   ;;  %s2551_s20 = sshll.u32 %s2996_s6, 9 }
  0x1e   : > { %v3054_v9 = vld [vmem:[%s335_s18] sm:$0xff]  ;;  %v350_v10 = vpack.c.bf16 %v338_v8, %v337_v7  ;;  %v3056_v11 = vld [vmem:[%s335_s18 + $0x8] sm:$0xff]  ;;  %v3060_v13 = vld [vmem:[%s335_s18 + $0x18] sm:$0xff]  ;;  %v696_v7 = vand.u32 127, %v695_v1  ;;  %s325_s18 = scalar_lea.vmem [#allocation5], %s2505_s14  ;;  %s3319_s24 = scalar_lea.hbm %s3416_s8, %s2551_s20 }
  0x1f   : > { %v481_v14 = vpack.c.bf16 %v3056_v11, %v3054_v9  ;;  %v482_v16 = vpack.c.bf16 %v3060_v13, %v3058_v12  ;;  %s2394_s19 = sshll.u32 %s325_s18, 4  ;;  %s3311_s19 = int_to_ptr.vmem [resolvable:$true] %s2394_s19 }
  0x20   : > { %2597 = vmatpush3.bf16.msra.mxu0 %v350_v10  ;;  %vm697_vm3 = vcmp.lt.s32.totalorder %v696_v7, 64  ;;  %s2824_s26 = scalar_lea.vmem %s3311_s19, 512 }
  0x21   : > { %2610 = vmatprep.subr.bf16.mxu1 %v481_v14  ;;  %2626 = vmatprep.subr.mxu0 %v2920_v0  ;;  %p2825_p11 = scmp.ne.s32.totalorder %s3311_s19, %s2824_s26 }
  0x22   : > { %2611 = vmatpush3.bf16.msra.mxu1 %v481_v14 }
  0x23   : > { %2599 = vmatmul.mubr.msk.bf16.vlgmr.msra.gmra.mrb[0].mxu0 %vm402_vm2, %v2757_v15  ;;  %2612 = vmatprep.subr.bf16.mxu1 %v482_v16  ;;  %p2826_p12 = pnand %p2825_p11, %p3013_p5 }
  0x24   : > { %2602 = vmatprep.mubr.msk.bf16.mxu0 %vm2921_vm0, %v2920_v0 }
  0x25   : > { %p2827_p13 = pneg %p2826_p12 }
  0x26   : > { %2613 = vmatpush3.bf16.msra.mxu1 %v482_v16 }
  0x27   : > { %2636 = vmatprep.subr.mxu1 %v2920_v0 }
  0x29   : > { %2615 = vmatmul.mubr.msk.bf16.vlgmr.msra.gmra.mrb[0].mxu1 %vm585_vm1, %v2759_v19 }
  0x2a   : > { %2618 = vmatprep.mubr.msk.bf16.mxu1 %vm585_vm1, %v2760_v20 }
  0x2b   : > { %2603 = vmatmul.mubr.msk.bf16.gmra.mrb[4].mxu0 %vm402_vm2, %v2764_v24 }
  0x2c   : > { %2606 = vmatprep.mubr.msk.bf16.mxu0 %vm2921_vm0, %v2920_v0 }
  0x31   : > { %2619 = vmatmul.mubr.msk.bf16.gmra.mrb[4].mxu1 %vm585_vm1, %v2761_v21 }
  0x32   : > { %2622 = vmatprep.mubr.msk.bf16.mxu1 %vm585_vm1, %v2762_v22 }
  0x33   : > { %2607 = vmatmul.mubr.msk.bf16.gmra.mrb[8].mxu0 %vm402_vm2, %v2765_v25 }
  0x34   : > { %2628 = vmatprep.mubr.msk.f32.mxu0 %vm2921_vm0, %v2920_v0 }
  0x39   : > { %2623 = vmatmul.mubr.msk.bf16.gmra.mrb[8].mxu1 %vm585_vm1, %v2763_v23 }
  0x3a   : > { %2638 = vmatprep.mubr.msk.f32.mxu1 %vm2921_vm0, %v2920_v0 }
  0x93   : > { %v360_v26 = vpop.permute.xlu0 %359 }
  0x94   : > { %v498_v27 = vpop.permute.xlu1 %497 }
  0x97   : > { %v365_v28 = vpop.permute.xlu0 %364 }
  0x98   : > { %v503_v34 = vpop.permute.xlu1 %502 }
  0x9b   : > { %v508_v36 = vpop.permute.xlu0 %507 }
  0x9c   : > { %v513_v42 = vpop.permute.xlu1 %512 }
  0xf6   : > { %v446_v29 = vpop.f32.mrb[0].mxu0 }
  0xf7   : > { %v447_v30 = vadd.f32 %v446_v29, %v360_v26  ;;  %v2600_v31 = vpop.f32.mrb[1].mxu0 }
  0xf8   : > { %v449_v32 = vpop.f32.mrb[2].mxu0 }
  0xf9   : > { %v450_v33 = vadd.f32 %v449_v32, %v365_v28  ;;  %685 = vmax.xlane.f32.xlu0 %v447_v30  ;;  %v2601_v35 = vpop.f32.mrb[3].mxu0 }
  0xfb   : > { %687 = vmax.xlane.f32.xlu1 %v450_v33 }
  0xfc   : > { %v2616_v37 = vpop.f32.mrb[0].mxu1 }
  0xfd   : > { %v647_v38 = vadd.f32 %v2616_v37, %v508_v36  ;;  %v638_v39 = vpop.f32.mrb[1].mxu1 }
  0xfe   : > { %v639_v40 = vadd.f32 %v638_v39, %v498_v27  ;;  %v2617_v41 = vpop.f32.mrb[2].mxu1  ;;  %v454_v35 = vpop.f32.mrb[4].mxu0 }
  0xff   : > { %v641_v43 = vpop.f32.mrb[3].mxu1  ;;  %1530 = vmax.xlane.f32.xlu1 %v647_v38  ;;  %v650_v44 = vadd.f32 %v2617_v41, %v513_v42  ;;  %v2604_v36 = vpop.f32.mrb[5].mxu0 }
 0x100   : > { %1526 = vmax.xlane.f32.xlu0 %v639_v40  ;;  %v642_v45 = vadd.f32 %v641_v43, %v503_v34  ;;  %v3161_v37 = vpop.f32.mrb[6].mxu0  ;;  %v353_v43 = vld [vmem:[%s3411_s3 + $0x10] sm:$0xff] }
 0x101   : > { %v2605_v39 = vpop.f32.mrb[7].mxu0 }
 0x104   : > { %1532 = vmax.xlane.f32.xlu0 %v650_v44  ;;  %v3114_v46 = vpop.f32.mrb[4].mxu1 }
 0x105   : > { %v3119_v48 = vpop.f32.mrb[5].mxu1 }
 0x106   : > { %v3121_v49 = vpop.f32.mrb[6].mxu1 }
 0x107   : > { %v3123_v50 = vpop.f32.mrb[7].mxu1 }
 0x108   : > { %1528 = vmax.xlane.f32.xlu0 %v642_v45 }
 0x10c   : > { %v3125_v51 = vpop.f32.mrb[8].mxu1 }
 0x10d   : > { %v670_v53 = vpop.f32.mrb[9].mxu1 }
 0x10e   : > { %v3130_v54 = vpop.f32.mrb[10].mxu1 }
 0x10f   : > { %v673_v55 = vpop.f32.mrb[11].mxu1 }
 0x110   : > { %537 = vperm.xlu1 %2756, %v491_v47   ;;  %v354_v47 = vld [vmem:[%s3411_s3 + $0x18] sm:$0xff] }
 0x114   : > { %552 = vperm.xlu1 %2756, %v494_v52   ;;  %v489_v52 = vld [vmem:[%s3413_s5 + $0x30] sm:$0xff] }
 0x11e   : > { %542 = vperm.xlu0 %2755, %v492_v56   ;;  %v490_v56 = vld [vmem:[%s3413_s5 + $0x38] sm:$0xff] }
 0x122   : > { %547 = vperm.xlu0 %2755, %v493_v57  }
 0x186   : > { %v686_v58 = vpop.xlane.xlu0 %685 }
 0x187   : > { %v689_v59 = vsub.f32 %v447_v30, %v686_v58 }
 0x188   : > { %v688_v60 = vpop.xlane.xlu1 %687 }
 0x189   : > { %v691_v61 = vmul.f32 1.442695, %v689_v59  ;;  %v690_v62 = vsub.f32 %v450_v33, %v688_v60 }
 0x18b   : > { %2766 = vpow2.f32 %v691_v61  ;;  %v693_v63 = vmul.f32 1.442695, %v690_v62 }
 0x18c   : > { %v1531_v2 = vpop.xlane.xlu1 %1530 }
 0x18d   : > { %2768 = vpow2.f32 %v693_v63  ;;  %v1527_v3 = vpop.xlane.xlu0 %1526  ;;  %v1536_v4 = vsub.f32 %v647_v38, %v1531_v2  ;;  %v356_v38 = vld [vmem:[%s3411_s3 + $0x28] sm:$0xff] }
 0x18e   : > { %v1534_v5 = vsub.f32 %v639_v40, %v1527_v3  ;;  %v462_v40 = vpop.f32.mrb[8].mxu0 }
 0x18f   : > { %v1542_v6 = vmul.f32 1.442695, %v1536_v4  ;;  %v2608_v41 = vpop.f32.mrb[9].mxu0 }
 0x190   : > { %v1538_v8 = vmul.f32 1.442695, %v1534_v5  ;;  %v538_v10 = vpop.permute.xlu1 %537  ;;  %v3166_v42 = vpop.f32.mrb[10].mxu0 }
 0x191   : > { %2770 = vpow2.f32 %v1542_v6  ;;  %v1533_v14 = vpop.xlane.xlu0 %1532  ;;  %v671_v15 = vadd.f32 %v670_v53, %v538_v10  ;;  %v487_v53 = vld [vmem:[%s3413_s5 + $0x20] sm:$0xff] }
 0x192   : > { %v1537_v16 = vsub.f32 %v650_v44, %v1533_v14  ;;  %2772 = vpow2.f32 %v1538_v8  ;;  %v355_v44 = vld [vmem:[%s3411_s3 + $0x20] sm:$0xff] }
 0x193   : > { %2627 = vmatpush3.xpose.msra.mxu0 %v671_v15 }
 0x194   : > { %v1544_v17 = vmul.f32 1.442695, %v1537_v16  ;;  %2631 = vmatprep.subr.mxu0 %v2920_v0  ;;  %v553_v57 = vpop.permute.xlu1 %552 }
 0x195   : > { %v2767_v18 = vpop.eup %2766  ;;  %v1529_v19 = vpop.xlane.xlu0 %1528  ;;  %v682_v8 = vadd.f32 %v3130_v54, %v553_v57 }
 0x196   : > { %v1535_v20 = vsub.f32 %v642_v45, %v1529_v19  ;;  %v698_v21 = vsel %vm697_vm3, %v2767_v18, 0.0  ;;  %2774 = vpow2.f32 %v1544_v17  ;;  %v2609_v45 = vpop.f32.mrb[11].mxu0 }
 0x197   : > { %v2769_v22 = vpop.eup %2768  ;;  %700 = vadd.xlane.f32.xlu1 %v698_v21 }
 0x198   : > { %v1540_v23 = vmul.f32 1.442695, %v1535_v20  ;;  %v3141_v24 = vsel %vm697_vm3, %v2769_v22, 0.0 }
 0x199   : > { %702 = vadd.xlane.f32.xlu0 %v3141_v24 }
 0x19a   : > { %2776 = vpow2.f32 %v1540_v23 }
 0x19b   : > { %v2771_v25 = vpop.eup %2770 }
 0x19c   : > { %v3145_v26 = vsel %vm697_vm3, %v2771_v25, 0.0  ;;  %v2773_v27 = vpop.eup %2772 }
 0x19d   : > { %v543_v28 = vpop.permute.xlu0 %542  ;;  %1554 = vadd.xlane.f32.xlu0 %v3145_v26  ;;  %v3149_v30 = vsel %vm697_vm3, %v2773_v27, 0.0 }
 0x19e   : > { %v674_v29 = vadd.f32 %v673_v55, %v543_v28  ;;  %v488_v55 = vld [vmem:[%s3413_s5 + $0x28] sm:$0xff] }
 0x1a0   : > { %2637 = vmatpush3.xpose.msra.mxu1 %v674_v29  ;;  %v2775_v31 = vpop.eup %2774 }
 0x1a1   : > { %1550 = vadd.xlane.f32.xlu0 %v3149_v30  ;;  %2646 = vmatprep.subr.mxu1 %v2920_v0  ;;  %v3154_v33 = vsel %vm697_vm3, %v2775_v31, 0.0  ;;  %v548_v58 = vpop.permute.xlu0 %547 }
 0x1a2   : > { %v679_v4 = vadd.f32 %v3125_v51, %v548_v58 }
 0x1a4   : > { %v2777_v32 = vpop.eup %2776 }
 0x1a5   : > { %v3157_v34 = vsel %vm697_vm3, %v2777_v32, 0.0  ;;  %1556 = vadd.xlane.f32.xlu0 %v3154_v33 }
 0x1a6   : > { %1552 = vadd.xlane.f32.xlu1 %v3157_v34 }
 0x1b7   : > { %384 = vperm.xlu1 %2756, %v356_v38  }
 0x1bb   : > { %369 = vperm.xlu1 %2756, %v353_v43   ;;  %379 = vperm.xlu0 %2755, %v355_v44  }
 0x1bf   : > { %374 = vperm.xlu1 %2756, %v354_v47   ;;  %527 = vperm.xlu0 %2755, %v489_v52  }
 0x1c3   : > { %517 = vperm.xlu1 %2756, %v487_v53  }
 0x1c7   : > { %522 = vperm.xlu1 %2756, %v488_v55  }
 0x1cb   : > { %532 = vperm.xlu1 %2756, %v490_v56  }
 0x224   : > { %v701_v59 = vpop.xlane.xlu1 %700 }
 0x225   : > { %2778 = vrcp.f32 %v701_v59 }
 0x226   : > { %v703_v60 = vpop.xlane.xlu0 %702 }
 0x227   : > { %2780 = vrcp.f32 %v703_v60 }
 0x22a   : > { %v1555_v61 = vpop.xlane.xlu0 %1554 }
 0x22e   : > { %v1551_v62 = vpop.xlane.xlu0 %1550 }
 0x22f   : > { %v2779_v63 = vpop.eup %2778  ;;  %2782 = vrcp.f32 %v1551_v62 }
 0x230   : > { %v706_v1 = vmul.f32 %v2779_v63, %v698_v21 }
 0x231   : > { %v2781_v3 = vpop.eup %2780 }
 0x232   : > { %2629 = vmatmul.mubr.f32.vlgmr.msra.gmra.mrb[12].mxu0 %v706_v1  ;;  %v935_v2 = vrot.slane %v706_v1, 4  ;;  %v1557_v6 = vpop.xlane.xlu0 %1556  ;;  %v707_v7 = vmul.f32 %v2781_v3, %v3141_v24 }
 0x233   : > { %v1553_v5 = vpop.xlane.xlu1 %1552  ;;  %2633 = vmatprep.mubr.msk.f32.mxu0 %vm2921_vm0, %v2920_v0 }
 0x234   : > { %2639 = vmatmul.mubr.f32.vlgmr.msra.gmra.mrb[12].mxu1 %v935_v2  ;;  %2784 = vrcp.f32 %v1553_v5  ;;  %v1342_v14 = vrot.slane %v707_v7, 4 }
 0x235   : > { %2647 = vmatpush3.xpose.msra.mxu1 %v679_v4  ;;  %2648 = vmatprep.mubr.msk.f32.mxu1 %vm2921_vm0, %v2920_v0  ;;  %2786 = vrcp.f32 %v1555_v61 }
 0x236   : > { %2656 = vmatprep.subr.mxu1 %v2920_v0  ;;  %2788 = vrcp.f32 %v1557_v6 }
 0x237   : > { %v385_v10 = vpop.permute.xlu1 %384 }
 0x238   : > { %2649 = vmatmul.mubr.f32.vlgmr.msra.gmra.mrb[14].mxu1 %v707_v7  ;;  %v466_v27 = vadd.f32 %v3166_v42, %v385_v10 }
 0x239   : > { %2657 = vmatpush3.xpose.msra.mxu1 %v682_v8  ;;  %2658 = vmatprep.mubr.msk.f32.mxu1 %vm2921_vm0, %v2920_v0  ;;  %v2783_v15 = vpop.eup %2782 }
 0x23a   : > { %v380_v51 = vpop.permute.xlu0 %379  ;;  %2666 = vmatprep.subr.mxu1 %v2920_v0  ;;  %v1562_v19 = vmul.f32 %v2783_v15, %v3149_v30  ;;  %v2176_v32 = vrot.slane %v466_v27, 4 }
 0x23b   : > { %v463_v16 = vadd.f32 %v462_v40, %v380_v51  ;;  %v370_v17 = vpop.permute.xlu1 %369 }
 0x23c   : > { %v3200_v18 = vadd.f32 %v454_v35, %v370_v17  ;;  %2659 = vmatmul.mubr.f32.vlgmr.msra.gmra.mrb[16].mxu1 %v1342_v14 }
 0x23d   : > { %2667 = vmatpush3.xpose.msra.mxu1 %v463_v16  ;;  %2668 = vmatprep.mubr.msk.f32.mxu1 %vm2921_vm0, %v2920_v0  ;;  %v1780_v21 = vrot.slane %v463_v16, 4 }
 0x23e   : > { %v709_v54 = vsel %vm708_vm4, %v3200_v18, -inf  ;;  %2676 = vmatprep.subr.mxu1 %v2920_v0  ;;  %v2785_v20 = vpop.eup %2784  ;;  %v912_v7 = vsel %vm911_vm5, %v3200_v18, -inf }
 0x23f   : > { %v710_v22 = vrot.slane %v709_v54, 4  ;;  %v1563_v24 = vmul.f32 %v2785_v20, %v3157_v34  ;;  %v2787_v25 = vpop.eup %2786  ;;  %v375_v8 = vpop.permute.xlu1 %374  ;;  %v913_v10 = vrot.slane %v912_v7, 4 }
 0x240   : > { %2669 = vmatmul.mubr.f32.vlgmr.msra.gmra.mrb[18].mxu1 %v1562_v19  ;;  %v1564_v30 = vmul.f32 %v2787_v25, %v3145_v26  ;;  %v2789_v31 = vpop.eup %2788  ;;  %v458_v51 = vadd.f32 %v3161_v37, %v375_v8  ;;  %v528_v37 = vpop.permute.xlu0 %527 }
 0x241   : > { %v711_v23 = vmax.f32 %v709_v54, %v710_v22  ;;  %2677 = vmatpush3.xpose.msra.mxu1 %v1780_v21  ;;  %2678 = vmatprep.mubr.msk.f32.mxu1 %vm2921_vm0, %v2920_v0  ;;  %v1565_v36 = vmul.f32 %v2789_v31, %v3154_v33  ;;  %v914_v14 = vmax.f32 %v912_v7, %v913_v10 }
 0x242   : > { %2686 = vmatprep.subr.mxu1 %v2920_v0  ;;  %v1319_v15 = vsel %vm911_vm5, %v458_v51, -inf  ;;  %v1119_v17 = vsel %vm708_vm4, %v458_v51, -inf }
 0x243   : > { %v712_v28 = vrot.slane %v711_v23, 2  ;;  %v915_v16 = vrot.slane %v914_v14, 2  ;;  %v1320_v54 = vrot.slane %v1319_v15, 4  ;;  %v1120_v19 = vrot.slane %v1119_v17, 4  ;;  %v518_v22 = vpop.permute.xlu1 %517 }
 0x244   : > { %2679 = vmatmul.mubr.f32.vlgmr.msra.gmra.mrb[20].mxu1 %v1563_v24 }
 0x245   : > { %v713_v29 = vmax.f32 %v711_v23, %v712_v28  ;;  %2687 = vmatpush3.xpose.msra.mxu1 %v466_v27  ;;  %2688 = vmatprep.mubr.msk.f32.mxu1 %vm2921_vm0, %v2920_v0  ;;  %v916_v20 = vmax.f32 %v914_v14, %v915_v16  ;;  %v1321_v21 = vmax.f32 %v1319_v15, %v1320_v54 }
 0x246   : > { %2696 = vmatprep.subr.mxu1 %v2920_v0  ;;  %v1121_v23 = vmax.f32 %v1119_v17, %v1120_v19  ;;  %v655_v28 = vadd.f32 %v3119_v48, %v518_v22 }
 0x247   : > { %v714_v35 = vrot.slane %v713_v29, 1  ;;  %v917_v24 = vrot.slane %v916_v20, 1  ;;  %v1322_v25 = vrot.slane %v1321_v21, 2  ;;  %v523_v31 = vpop.permute.xlu1 %522 }
 0x248   : > { %2689 = vmatmul.mubr.f32.vlgmr.msra.gmra.mrb[22].mxu1 %v1564_v30  ;;  %v1122_v27 = vrot.slane %v1121_v23, 2 }
 0x249   : > { %v715_v34 = vmax.f32 %v713_v29, %v714_v35  ;;  %2697 = vmatpush3.xpose.msra.mxu1 %v2176_v32  ;;  %2698 = vmatprep.mubr.msk.f32.mxu1 %vm2921_vm0, %v2920_v0  ;;  %v918_v29 = vmax.f32 %v916_v20, %v917_v24  ;;  %v1323_v30 = vmax.f32 %v1321_v21, %v1322_v25  ;;  %v1566_v35 = vrot.slane %v655_v28, 4 }
 0x24a   : > { %v1123_v32 = vmax.f32 %v1121_v23, %v1122_v27 }
 0x24b   : > { %v716_v38 = vsub.f32 %v3200_v18, %v715_v34  ;;  %v658_v34 = vadd.f32 %v3123_v50, %v523_v31 }
 0x24c   : > { %2699 = vmatmul.mubr.f32.vlgmr.msra.gmra.mrb[24].mxu1 %v1565_v36  ;;  %v919_v36 = vsub.f32 %v3200_v18, %v918_v29 }
 0x24d   : > { %v717_v39 = vmul.f32 1.442695, %v716_v38  ;;  %v1324_v38 = vrot.slane %v1323_v30, 1 }
 0x24f   : > { %2790 = vpow2.f32 %v717_v39  ;;  %v663_v39 = vadd.f32 %v3114_v46, %v528_v37 }
 0x251   : > { %v1963_v48 = vrot.slane %v663_v39, 4 }
 0x253   : > { %v1964_v50 = vmax.f32 %v663_v39, %v1963_v48 }
 0x259   : > { %v2791_v40 = vpop.eup %2790 }
 0x25a   : > { %v719_v26 = vsel %vm708_vm4, %v2791_v40, 0.0 }
 0x25b   : > { %v720_v41 = vrot.slane %v719_v26, 4 }
 0x25d   : > { %v721_v42 = vadd.f32 %v720_v41, %v719_v26  ;;  %v1567_v26 = vmax.f32 %v655_v28, %v1566_v35  ;;  %v1762_v41 = vrot.slane %v658_v34, 4 }
 0x25f   : > { %v722_v43 = vrot.slane %v721_v42, 2 }
 0x261   : > { %v723_v44 = vadd.f32 %v722_v43, %v721_v42  ;;  %v920_v42 = vmul.f32 1.442695, %v919_v36  ;;  %v1325_v43 = vmax.f32 %v1323_v30, %v1324_v38 }
 0x263   : > { %v724_v45 = vrot.slane %v723_v44, 1 }
 0x265   : > { %v725_v47 = vadd.f32 %v724_v45, %v723_v44  ;;  %v533_v44 = vpop.permute.xlu1 %532 }
 0x267   : > { %2792 = vrcp.f32 %v725_v47  ;;  %v1568_v47 = vrot.slane %v1567_v26, 2 }
 0x268   : > { %2794 = vpow2.f32 %v920_v42 }
 0x269   : > { %v1569_v18 = vmax.f32 %v1567_v26, %v1568_v47 }
 0x271   : > { %v2793_v52 = vpop.eup %2792 }
 0x272   : > { %v727_v53 = vmul.f32 %v2793_v52, %v2791_v40  ;;  %v1124_v40 = vrot.slane %v1123_v32, 1  ;;  %v1763_v52 = vmax.f32 %v658_v34, %v1762_v41 }
 0x274   : > { %2632 = vmatpush3.msk.msra.mxu0 %vm708_vm4, %v727_v53  ;;  %v1125_v45 = vmax.f32 %v1123_v32, %v1124_v40  ;;  %v666_v53 = vadd.f32 %v3121_v49, %v533_v44 }
 0x275   : > { %2641 = vmatprep.subr.mxu0 %v2920_v0 }
 0x305   : > { %v794_v33 = vpop.f32.mrb[12].mxu0 }
 0x306   : > { %798 = vxpose.xlu0.b32.start.end [1/1] (short) (narrow) %v794_v33, 8  ;;  %v2630_v55 = vpop.f32.mrb[13].mxu0  ;;  %v1326_v33 = vsub.f32 %v458_v51, %v1325_v43 }
 0x307   : > { %v1003_v56 = vpop.f32.mrb[12].mxu1  ;;  %v1126_v55 = vsub.f32 %v458_v51, %v1125_v45 }
 0x308   : > { %1007 = vxpose.xlu1.b32.start.end [1/1] (short) (narrow) %v1003_v56, 8  ;;  %v2640_v57 = vpop.f32.mrb[13].mxu1  ;;  %v1764_v56 = vrot.slane %v1763_v52, 2  ;;  %v1327_v46 = vmul.f32 1.442695, %v1326_v33 }
 0x309   : > { %v2158_v57 = vrot.slane %v666_v53, 4 }
 0x30a   : > { %2796 = vpow2.f32 %v1327_v46 }
 0x30b   : > { %v1204_v58 = vpop.f32.mrb[14].mxu1 }
 0x30c   : > { %v2650_v59 = vpop.f32.mrb[15].mxu1  ;;  %1208 = vxpose.xlu0.b32.start.end [1/1] (short) (narrow) %v1204_v58, 8  ;;  %v1965_v58 = vrot.slane %v1964_v50, 2 }
 0x30d   : > { %v1127_v59 = vmul.f32 1.442695, %v1126_v55 }
 0x30f   : > { %v1410_v60 = vpop.f32.mrb[16].mxu1  ;;  %2798 = vpow2.f32 %v1127_v59 }
 0x310   : > { %v2660_v61 = vpop.f32.mrb[17].mxu1  ;;  %1414 = vxpose.xlu0.b32.start.end [1/1] (short) (narrow) %v1410_v60, 8  ;;  %v1570_v60 = vrot.slane %v1569_v18, 1 }
 0x311   : > { %v1765_v61 = vmax.f32 %v1763_v52, %v1764_v56 }
 0x313   : > { %v1649_v62 = vpop.f32.mrb[18].mxu1  ;;  %v1766_v49 = vrot.slane %v1765_v61, 1 }
 0x314   : > { %v2670_v63 = vpop.f32.mrb[19].mxu1  ;;  %1653 = vxpose.xlu0.b32.start.end [1/1] (short) (narrow) %v1649_v62, 8  ;;  %v2159_v62 = vmax.f32 %v666_v53, %v2158_v57 }
 0x315   : > { %v3232_v63 = vpop.eup %2794  ;;  %v1767_v7 = vmax.f32 %v1765_v61, %v1766_v49 }
 0x316   : > { %v3236_v51 = vpop.eup %2796 }
 0x317   : > { %v1848_v1 = vpop.f32.mrb[20].mxu1  ;;  %v1768_v16 = vsub.f32 %v658_v34, %v1767_v7  ;;  %v1330_v20 = vrot.slane %v3236_v51, 4 }
 0x318   : > { %1852 = vxpose.xlu1.b32.start.end [1/1] (short) (narrow) %v1848_v1, 8  ;;  %v2680_v2 = vpop.f32.mrb[21].mxu1  ;;  %v1966_v1 = vmax.f32 %v1964_v50, %v1965_v58 }
 0x319   : > { %v1571_v2 = vmax.f32 %v1569_v18, %v1570_v60  ;;  %v3238_v19 = vpop.eup %2798  ;;  %v1769_v22 = vmul.f32 1.442695, %v1768_v16  ;;  %v1332_v27 = vsel %vm708_vm4, %v1330_v20, 0.0 }
 0x31a   : > { %v1129_v25 = vsel %vm708_vm4, %v3238_v19, 0.0  ;;  %v1333_v37 = vrot.slane %v1332_v27, 4 }
 0x31b   : > { %v2046_v3 = vpop.f32.mrb[22].mxu1  ;;  %v1130_v29 = vrot.slane %v1129_v25, 4 }
 0x31c   : > { %v2690_v4 = vpop.f32.mrb[23].mxu1  ;;  %2050 = vxpose.xlu0.b32.start.end [1/1] (short) (narrow) %v2046_v3, 8  ;;  %v2160_v3 = vrot.slane %v2159_v62, 2  ;;  %v1334_v36 = vadd.f32 %v1333_v37, %v1332_v27 }
 0x31d   : > { %v923_v4 = vrot.slane %v3232_v63, 4  ;;  %v1131_v32 = vadd.f32 %v1130_v29, %v1129_v25 }
 0x31e   : > { %v2161_v8 = vmax.f32 %v2159_v62, %v2160_v3  ;;  %v1335_v40 = vrot.slane %v1334_v36, 2 }
 0x31f   : > { %v2244_v5 = vpop.f32.mrb[24].mxu1  ;;  %v925_v10 = vsel %vm708_vm4, %v923_v4, 0.0 }
 0x320   : > { %2248 = vxpose.xlu1.b32.start.end [1/1] (short) (narrow) %v2244_v5, 8  ;;  %v2700_v6 = vpop.f32.mrb[25].mxu1  ;;  %v1967_v5 = vrot.slane %v1966_v1, 1  ;;  %v2162_v17 = vrot.slane %v2161_v8, 1  ;;  %v926_v54 = vrot.slane %v925_v10, 4  ;;  %v1336_v48 = vadd.f32 %v1335_v40, %v1334_v36 }
 0x321   : > { %v1572_v6 = vsub.f32 %v655_v28, %v1571_v2 }
 0x322   : > { %v1968_v14 = vmax.f32 %v1966_v1, %v1967_v5  ;;  %v2163_v23 = vmax.f32 %v2161_v8, %v2162_v17  ;;  %v927_v24 = vadd.f32 %v926_v54, %v925_v10  ;;  %v1337_v50 = vrot.slane %v1336_v48, 1 }
 0x323   : > { %v1573_v15 = vmul.f32 1.442695, %v1572_v6 }
 0x324   : > { %v1969_v21 = vsub.f32 %v663_v39, %v1968_v14  ;;  %v2164_v30 = vsub.f32 %v666_v53, %v2163_v23  ;;  %v928_v31 = vrot.slane %v927_v24, 2  ;;  %v1132_v39 = vrot.slane %v1131_v32, 2 }
 0x325   : > { %2800 = vpow2.f32 %v1573_v15  ;;  %v1338_v58 = vadd.f32 %v1337_v50, %v1336_v48 }
 0x326   : > { %v1970_v28 = vmul.f32 1.442695, %v1969_v21  ;;  %2802 = vpow2.f32 %v1769_v22  ;;  %v2165_v35 = vmul.f32 1.442695, %v2164_v30  ;;  %v929_v34 = vadd.f32 %v928_v31, %v927_v24 }
 0x327   : > { %v1133_v43 = vadd.f32 %v1132_v39, %v1131_v32 }
 0x328   : > { %2804 = vpow2.f32 %v1970_v28  ;;  %v930_v26 = vrot.slane %v929_v34, 1 }
 0x329   : > { %2806 = vpow2.f32 %v2165_v35  ;;  %v1134_v53 = vrot.slane %v1133_v43, 1 }
 0x32a   : > { %v931_v45 = vadd.f32 %v930_v26, %v929_v34  ;;  %v3301_v26 = vstv %s343_s28  ;;  %s2828_s28 = sshll.u32 %s2923_s27, 4  ;;  %s2829_s28 = int_to_ptr.vmem [resolvable:$false] %s2828_s28 }
 0x32b   : > { %v1135_v57 = vadd.f32 %v1134_v53, %v1133_v43  ;;  %s2830_s14 = scalar_lea.vmem %s2829_s28, 1024  ;;  %p2831_p0 = scmp.lt.s32.totalorder %s3311_s19, %s2829_s28 }
 0x32c   : > { %2808 = vrcp.f32 %v931_v45  ;;  %p2832_p1 = scmp.lt.s32.totalorder %s2830_s14, %s2824_s26 }
 0x32d   : > { %2810 = vrcp.f32 %v1135_v57 }
 0x32e   : > { %2812 = vrcp.f32 %v1338_v58  ;;  %p2833_p2 = por %p2832_p1, %p2831_p0 }
 0x32f   : > { %v3244_v38 = vpop.eup %2800 }
 0x330   : > { %v1575_v41 = vrot.slane %v3244_v38, 4  ;;  %v3247_v42 = vpop.eup %2802  ;;  %p2834_p3 = pnand %p2833_p2, %p2827_p13 }
 0x331   : > { %v1771_v52 = vrot.slane %v3247_v42, 4 }
 0x332   : > { %v3249_v44 = vpop.eup %2804  ;;  %v1576_v47 = vadd.f32 %v3244_v38, %v1575_v41 }
 0x333   : > { %v1972_v33 = vrot.slane %v3249_v44, 4  ;;  %v1772_v18 = vadd.f32 %v3247_v42, %v1771_v52  ;;  %v3255_v56 = vpop.eup %2806 }
 0x334   : > { %v1577_v55 = vrot.slane %v1576_v47, 2  ;;  %v2167_v61 = vrot.slane %v3255_v56, 4 }
 0x335   : > { %v1973_v46 = vadd.f32 %v3249_v44, %v1972_v33  ;;  %v1773_v60 = vrot.slane %v1772_v18, 2 }
 0x336   : > { %v1578_v59 = vadd.f32 %v1577_v55, %v1576_v47  ;;  %v2168_v49 = vadd.f32 %v3255_v56, %v2167_v61  ;;  %v2809_v3 = vpop.eup %2808 }
 0x337   : > { %v1974_v62 = vrot.slane %v1973_v46, 2  ;;  %v1774_v2 = vadd.f32 %v1773_v60, %v1772_v18  ;;  %v933_v8 = vmul.f32 %v2809_v3, %v3232_v63  ;;  %v2811_v16 = vpop.eup %2810 }
 0x338   : > { %v1579_v1 = vrot.slane %v1578_v59, 1  ;;  %v2169_v7 = vrot.slane %v2168_v49, 2  ;;  %v2813_v20 = vpop.eup %2812  ;;  %v1137_v23 = vmul.f32 %v2811_v16, %v3238_v19 }
 0x339   : > { %v1775_v5 = vrot.slane %v1774_v2, 1  ;;  %v1975_v6 = vadd.f32 %v1974_v62, %v1973_v46  ;;  %v1040_v54 = vrot.slane %v933_v8, 4  ;;  %v1340_v24 = vmul.f32 %v2813_v20, %v3236_v51 }
 0x33a   : > { %v1580_v4 = vadd.f32 %v1579_v1, %v1578_v59  ;;  %v2170_v15 = vadd.f32 %v2169_v7, %v2168_v49 }
 0x33b   : > { %v1776_v10 = vadd.f32 %v1775_v5, %v1774_v2  ;;  %v1976_v14 = vrot.slane %v1975_v6, 1  ;;  %v1447_v28 = vrot.slane %v1340_v24, 4 }
 0x33c   : > { %2814 = vrcp.f32 %v1580_v4  ;;  %v2171_v22 = vrot.slane %v2170_v15, 1 }
 0x33d   : > { %2816 = vrcp.f32 %v1776_v10  ;;  %v1977_v63 = vadd.f32 %v1976_v14, %v1975_v6 }
 0x33e   : > { %v2172_v27 = vadd.f32 %v2171_v22, %v2170_v15 }
 0x33f   : > { %2818 = vrcp.f32 %v1977_v63 }
 0x340   : > { %2820 = vrcp.f32 %v2172_v27 }
 0x346   : > { %v2815_v29 = vpop.eup %2814 }
 0x347   : > { %v1582_v19 = vmul.f32 %v2815_v29, %v3244_v38  ;;  %v2817_v30 = vpop.eup %2816 }
 0x348   : > { %v1778_v37 = vmul.f32 %v2817_v30, %v3247_v42 }
 0x349   : > { %v2819_v32 = vpop.eup %2818 }
 0x34a   : > { %v1979_v34 = vmul.f32 %v2819_v32, %v3249_v44  ;;  %v2821_v36 = vpop.eup %2820 }
 0x34b   : > { %v2174_v39 = vmul.f32 %v2821_v36, %v3255_v56 }
 0x386   : > { %v814_v17 = vpop.trf.xlu0 }
 0x387   : > { %2634 = vmatmul.mubr.msk.f32.vlgmr.msra.gmra.mrb[14].mxu0 %vm830_vm6, %v814_v17 }
 0x388   : > { %2642 = vmatpush3.msk.msra.mxu0 %vm708_vm4, %v1040_v54  ;;  %v1023_v21 = vpop.trf.xlu1  ;;  %2643 = vmatprep.mubr.msk.f32.mxu0 %vm2921_vm0, %v2920_v0 }
 0x389   : > { %2651 = vmatprep.subr.mxu0 %v2920_v0 }
 0x38b   : > { %2644 = vmatmul.mubr.msk.f32.vlgmr.msra.gmra.mrb[16].mxu0 %vm830_vm6, %v1023_v21 }
 0x38c   : > { %2652 = vmatpush3.msk.msra.mxu0 %vm708_vm4, %v1137_v23  ;;  %2653 = vmatprep.mubr.msk.f32.mxu0 %vm2921_vm0, %v2920_v0  ;;  %v1224_v25 = vpop.trf.xlu0 }
 0x38d   : > { %2661 = vmatprep.subr.mxu0 %v2920_v0 }
 0x38f   : > { %2654 = vmatmul.mubr.msk.f32.vlgmr.msra.gmra.mrb[18].mxu0 %vm830_vm6, %v1224_v25 }
 0x390   : > { %2662 = vmatpush3.msk.msra.mxu0 %vm708_vm4, %v1447_v28  ;;  %2663 = vmatprep.mubr.msk.f32.mxu0 %vm2921_vm0, %v2920_v0  ;;  %v1430_v51 = vpop.trf.xlu0 }
 0x391   : > { %2671 = vmatprep.subr.mxu0 %v2920_v0 }
 0x393   : > { %2664 = vmatmul.mubr.msk.f32.vlgmr.msra.gmra.mrb[20].mxu0 %vm830_vm6, %v1430_v51 }
 0x394   : > { %2672 = vmatpush3.msra.mxu0 %v1582_v19  ;;  %2673 = vmatprep.mubr.msk.f32.mxu0 %vm2921_vm0, %v2920_v0  ;;  %v1669_v31 = vpop.trf.xlu0 }
 0x395   : > { %2681 = vmatprep.subr.mxu0 %v2920_v0 }
 0x397   : > { %2674 = vmatmul.mubr.msk.f32.vlgmr.msra.gmra.mrb[22].mxu0 %vm1685_vm7, %v1669_v31 }
 0x398   : > { %2682 = vmatpush3.msra.mxu0 %v1778_v37  ;;  %v1868_v35 = vpop.trf.xlu1  ;;  %2683 = vmatprep.mubr.msk.f32.mxu0 %vm2921_vm0, %v2920_v0 }
 0x399   : > { %2691 = vmatprep.subr.mxu0 %v2920_v0 }
 0x39b   : > { %2684 = vmatmul.mubr.msk.f32.vlgmr.msra.gmra.mrb[24].mxu0 %vm1685_vm7, %v1868_v35 }
 0x39c   : > { %2692 = vmatpush3.msra.mxu0 %v1979_v34  ;;  %2693 = vmatprep.mubr.msk.f32.mxu0 %vm2921_vm0, %v2920_v0  ;;  %v2066_v38 = vpop.trf.xlu0 }
 0x39d   : > { %2701 = vmatprep.subr.mxu0 %v2920_v0 }
 0x39f   : > { %2694 = vmatmul.mubr.msk.f32.vlgmr.msra.gmra.mrb[26].mxu0 %vm1685_vm7, %v2066_v38 }
 0x3a0   : > { %2702 = vmatpush3.msra.mxu0 %v2174_v39  ;;  %v2264_v40 = vpop.trf.xlu1  ;;  %2703 = vmatprep.mubr.msk.f32.mxu0 %vm2921_vm0, %v2920_v0 }
 0x3a3   : > { %2704 = vmatmul.mubr.msk.f32.vlgmr.msra.gmra.mrb[28].mxu0 %vm1685_vm7, %v2264_v40 }
 0x45a   : > { %v903_v41 = vpop.f32.mrb[14].mxu0 }
 0x45b   : > { %v908_v42 = vmul.f32 %v3301_v26, %v903_v41  ;;  %v2635_v43 = vpop.f32.mrb[15].mxu0 }
 0x45d   : > { %v909_v44 = vadd.f32 %v908_v42, %v3054_v9 }
 0x45e   : > { %v1112_v48 = vpop.f32.mrb[16].mxu0 }
 0x45f   : > { %910 = vst [vmem:[%s325_s18] sm:$0xff] %v909_v44  ;;  %v1116_v0 = vmul.f32 %v1112_v48, %v3301_v26  ;;  %v2645_v45 = vpop.f32.mrb[17].mxu0 }
 0x461   : > { %v1117_v47 = vadd.f32 %v1116_v0, %v3056_v11 }
 0x462   : > { %v1312_v52 = vpop.f32.mrb[18].mxu0 }
 0x463   : > { %1118 = vst [vmem:[%s325_s18 + $0x8] sm:$0xff] %v1117_v47  ;;  %v1316_v53 = vmul.f32 %v1312_v52, %v3301_v26  ;;  %v2655_v33 = vpop.f32.mrb[19].mxu0 }
 0x465   : > { %v1317_v50 = vadd.f32 %v1316_v53, %v3058_v12 }
 0x466   : > { %v1519_v55 = vpop.f32.mrb[20].mxu0 }
 0x467   : > { %1318 = vst [vmem:[%s325_s18 + $0x10] sm:$0xff] %v1317_v50  ;;  %v1523_v9 = vmul.f32 %v1519_v55, %v3301_v26  ;;  %v2665_v11 = vpop.f32.mrb[21].mxu0 }
 0x469   : > { %v1524_v18 = vadd.f32 %v1523_v9, %v3060_v13 }
 0x46a   : > { %v1755_v12 = vpop.f32.mrb[22].mxu0 }
 0x46b   : > { %1525 = vst [vmem:[%s325_s18 + $0x18] sm:$0xff] %v1524_v18  ;;  %v1759_v56 = vmul.f32 %v1755_v12, %v3301_v26  ;;  %v2675_v57 = vpop.f32.mrb[23].mxu0 }
 0x46c   : > { %2837 = shalt.err (!%p2834_p3)
}
 0x46d   : > { %s2838_s18 = scalar_lea.hbm %s3319_s24, 512  ;;  %s2842_s23 = scalar_lea.hbm %s3416_s8, 1024 }
 0x46e   : > { %p2839_p4 = scmp.ne.s32.totalorder %s3319_s24, %s2838_s18  ;;  %p2843_p9 = scmp.lt.u32.totalorder %s3319_s24, %s3416_s8 }
 0x46f   : > { %p2844_p10 = scmp.lt.u32.totalorder %s2842_s23, %s2838_s18  ;;  %p2846_p12 = scmp.lt.u32.totalorder %s2838_s18, %s3319_s24 }
 0x470   : > { %p2840_p7 = pnand %p2839_p4, %p3013_p5 }
 0x471   : > { %p2845_p11 = por %p2844_p10, %p2843_p9 }
 0x472   : > { %p2841_p8 = pneg %p2840_p7 }
 0x473   : > { %p2847_p13 = por %p2846_p12, %p2845_p11 }
 0x475   : > { %p2848_p0 = pnand %p2847_p13, %p2841_p8 }
 0x477   : > { %2851 = shalt.err (!%p2848_p0)
}
 0x478   : > { %s2924_s26 = smov 128   ;;  %s2925_s14 = smov 8   ;;  %v2822_v13 = vld [vmem:[%s3041_s11] sm:$0xff]  ;;  %v1953_v58 = vpop.f32.mrb[24].mxu0  ;;  %v2823_v3 = vld [vmem:[%s3041_s11 + $0x8] sm:$0xff] }
 0x479   : > { %2707 = dma.vmem_to_hbm [thread:$0]  (%p3013_p5), %s3311_s19, 512, %s3319_s24, %s2365_s25, %s2924_s26, %s2924_s26, %s2925_s14   ;;  %v1760_v46 = vadd.f32 %v2822_v13, %v1759_v56  ;;  %v1957_v59 = vmul.f32 %v1953_v58, %v3301_v26  ;;  %v2685_v60 = vpop.f32.mrb[25].mxu0 }
 0x47a   : > { %s318_s18 = scalar_lea.vmem [#allocation3], %s2504_s21  ;;  %v2151_v62 = vpop.f32.mrb[26].mxu0  ;;  %s2550_s21 = sshll.u32 %s2996_s6, 8 }
 0x47b   : > { %1761 = vst [vmem:[%s318_s18] sm:$0xf] %v1760_v46  ;;  %v1959_v61 = vrot.slane %v1957_v59, 4  ;;  %v2155_v2 = vmul.f32 %v2151_v62, %v3301_v26  ;;  %v2695_v49 = vpop.f32.mrb[27].mxu0  ;;  %s2378_s19 = sshll.u32 %s318_s18, 4  ;;  %s3362_s11 = scalar_lea.hbm %s3415_s7, %s2550_s21  ;;  %s3357_s19 = int_to_ptr.vmem [resolvable:$true] %s2378_s19 }
 0x47c   : > { %v2349_v5 = vpop.f32.mrb[28].mxu0  ;;  %s2360_s20 = scalar_lea.sflag [#allocation4], %s3299_s13  ;;  %s2852_s22 = scalar_lea.vmem %s3357_s19, 256 }
 0x47d   : > { %v1961_v1 = vadd.f32 %v2822_v13, %v1959_v61  ;;  %v2156_v4 = vadd.f32 %v2823_v3, %v2155_v2  ;;  %v2353_v6 = vmul.f32 %v2349_v5, %v3301_v26  ;;  %v2705_v7 = vpop.f32.mrb[29].mxu0  ;;  %p2853_p1 = scmp.ne.s32.totalorder %s3357_s19, %s2852_s22  ;;  %s2926_s6 = smov [#allocation3]  }
 0x47e   : > { %s2856_s23 = sshll.u32 %s2926_s6, 4  ;;  %s2857_s23 = int_to_ptr.vmem [resolvable:$false] %s2856_s23 }
 0x47f   : > { %1962 = vst [vmem:[%s318_s18] sm:$0xf0] %v1961_v1  ;;  %2157 = vst [vmem:[%s318_s18 + $0x8] sm:$0xf] %v2156_v4  ;;  %v2355_v8 = vrot.slane %v2353_v6, 4  ;;  %p2854_p2 = pnand %p2853_p1, %p3013_p5  ;;  %s2858_s27 = scalar_lea.vmem %s2857_s23, 512 }
 0x480   : > { %p2859_p4 = scmp.lt.s32.totalorder %s3357_s19, %s2857_s23  ;;  %p2860_p7 = scmp.lt.s32.totalorder %s2858_s27, %s2852_s22 }
 0x481   : > { %v2357_v10 = vadd.f32 %v2823_v3, %v2355_v8  ;;  %p2855_p3 = pneg %p2854_p2 }
 0x482   : > { %p2861_p8 = por %p2860_p7, %p2859_p4 }
 0x483   : > { %2358 = vst [vmem:[%s318_s18 + $0x8] sm:$0xf0] %v2357_v10 }
 0x484   : > { %p2862_p9 = pnand %p2861_p8, %p2855_p3 }
 0x486   : > { %2865 = shalt.err (!%p2862_p9)
}
 0x487   : > { %s2866_s28 = scalar_lea.hbm %s3362_s11, 256  ;;  %s2870_s24 = scalar_lea.hbm %s3415_s7, 512 }
 0x488   : > { %p2867_p10 = scmp.ne.s32.totalorder %s3362_s11, %s2866_s28  ;;  %p2871_p13 = scmp.lt.u32.totalorder %s3362_s11, %s3415_s7 }
 0x489   : > { %p2872_p0 = scmp.lt.u32.totalorder %s2870_s24, %s2866_s28  ;;  %p2874_p2 = scmp.lt.u32.totalorder %s2866_s28, %s3362_s11 }
 0x48a   : > { %p2868_p11 = pnand %p2867_p10, %p3013_p5 }
 0x48b   : > { %p2873_p1 = por %p2872_p0, %p2871_p13 }
 0x48c   : > { %p2869_p12 = pneg %p2868_p11 }
 0x48d   : > { %p2875_p3 = por %p2874_p2, %p2873_p1 }
 0x48f   : > { %p2876_p4 = pnand %p2875_p3, %p2869_p12 }
 0x491   : > { %2879 = shalt.err (!%p2876_p4)
}
 0x492   : > { %2706 = dma.vmem_to_hbm [thread:$0]  (%p3013_p5), %s3357_s19, 256, %s3362_s11, %s2360_s20, %s2924_s26, %s2924_s26, %s2925_s14  }
 0x493 PF: > { %p2717_p7 = scmp.ge.s32.totalorder %s2918_s10, 2  ;;  %s2409_s22 = sand.u32 1, %s2906_s29  }
 0x494   : > { %s2410_s23 = scalar_lea.sflag [#allocation4], %s2409_s22 }
 0x495   : > { %p2711_p8 = pnand %p2717_p7, %p3017_p6 }
 0x497   : > { %2897 = dma.done.wait (!%p2711_p8), %s2410_s23, 256  }
 0x498   : > { %2899 = vsyncadd (!%p2711_p8), %s2410_s23, 4294967040  ;;  %s2419_s16 = scalar_lea.sflag [#allocation6], %s2409_s22 }
 0x499   : > { %2901 = dma.done.wait (!%p2711_p8), %s2419_s16, 512  }
 0x49a   : > { %2903 = vsyncadd (!%p2711_p8), %s2419_s16, 4294966784  ;;  %p23_p5 = scmp.ge.s32.totalorder %s3000_s12, 4   ;;  %s3419_s29 = smov %s2910_s30 }
 0x49b   : > { %s3420_s30 = smov %s2914_s9  ;;  %s3421_s9 = smov %s3011_s15 }
 0x49c   : > { %s3422_s10 = smov %s3000_s12  ;;  %25 = sbr.rel (!%p23_p5) target bundleno = 7 (0x7), region = 103 }
 0x4a3   :  { %2424 = vsyncpa [#allocation4], 1 }
 0x4a4   :  { %2426 = vsyncpa [#allocation4 + $0x1], 1 }
 0x4a5   :  { %2427 = vsyncpa [#allocation6], 1 }
 0x4a6   :  { %2429 = vsyncpa [#allocation6 + $0x1], 1 }

</bundles_post_ra>
